<compile_context>
chip_gen: v7x
topology: tpu7x:2x2x1
jax: 0.10.0
libtpu: 0.0.40
codegen_flags: <defaults>
</compile_context>

<pallas_src>
import functools
import math

import jax
import jax.numpy as jnp
from jax.experimental import pallas as pl
from jax.experimental.pallas import tpu as pltpu


def _cdiv(a, b):
    return -(-a // b)


def _round_up(x, m):
    return _cdiv(x, m) * m


def _jacobi_thetas(degree, a, b):
    """Host-side (float) recurrence coefficients for i = 2..degree
    (matches torch-conv-kan JacobiKANLayer)."""
    thetas = []
    for i in range(2, degree + 1):
        theta_k = (2 * i + a + b) * (2 * i + a + b - 1) / (2 * i * (i + a + b))
        theta_k1 = ((2 * i + a + b - 1) * (a * a - b * b)
                    / (2 * i * (i + a + b) * (2 * i + a + b - 2)))
        theta_k2 = ((i + a - 1) * (i + b - 1) * (2 * i + a + b)
                    / (i * (i + a + b) * (2 * i + a + b - 2)))
        thetas.append((float(theta_k), float(theta_k1), float(theta_k2)))
    return tuple(thetas)


def _kajn_fused_kernel(x_ref, *refs, n_layers, degree, a, b, thetas, mxu_dtype):
    """One batch tile through ALL KAJN layers.

    refs = (w_0, bias_0, w_1, bias_1, ..., w_{L-1}, bias_{L-1}, o_ref)
      w_l:    ((deg+1)*in_l, out_l)  packed [W_base^T; C_1; ..; C_deg]  (bf16)
      bias_l: (1, out_l)             sum_i C_0[i, :]                    (f32)
    """
    w_refs = refs[0:2 * n_layers:2]
    b_refs = refs[1:2 * n_layers:2]
    o_ref = refs[2 * n_layers]

    h = x_ref[...].astype(jnp.float32)
    for l in range(n_layers):
        # SiLU: exp on the EUP, approx reciprocal on the EUP -> VALU stays free.
        silu = h * pl.reciprocal(1.0 + jnp.exp(-h), approx=True)
        parts = [silu]
        if degree >= 1:
            t = jnp.tanh(h)
            p_prev = jnp.ones_like(t)
            p_curr = ((a - b) + (a + b + 2.0) * t) * 0.5
            parts.append(p_curr)
            # Statically unrolled f32 recurrence; only two P buffers live.
            for i in range(2, degree + 1):
                tk, tk1, tk2 = thetas[i - 2]
                p_next = (tk * t + tk1) * p_curr - tk2 * p_prev
                parts.append(p_next)
                p_prev, p_curr = p_curr, p_next
        # Stack base + polynomial terms along the lane (K) axis -> one MXU
        # matmul per layer with contraction depth (deg+1)*in.
        lhs = parts[0] if len(parts) == 1 else jnp.concatenate(parts, axis=-1)
        h = jnp.dot(lhs.astype(mxu_dtype), w_refs[l][...],
                    preferred_element_type=jnp.float32) + b_refs[l][...]

    o_ref[...] = h.astype(o_ref.dtype)


def _pack_layer(base_weights, jacobi_coeffs, degree, mxu_dtype):
    """Host-side packing of one JacobiKANLayer's parameters."""
    out_dim, in_dim = base_weights.shape
    assert jacobi_coeffs.shape == (in_dim, out_dim, degree + 1)
    planes = [jnp.transpose(base_weights)]                       # (in, out)
    planes += [jacobi_coeffs[:, :, d] for d in range(1, degree + 1)]
    w = jnp.concatenate(planes, axis=0).astype(mxu_dtype)        # ((deg+1)*in, out)
    # ones @ C_0 == column-sum of C_0: fold into a bias row instead of an MXU push.
    bias = jnp.sum(jacobi_coeffs[:, :, 0], axis=0,
                   dtype=jnp.float32)[None, :]                    # (1, out)
    return w, bias


def _vmem_capacity_bytes():
    try:
        cap = getattr(pltpu.get_tpu_info(), "vmem_capacity_bytes", None)
        if cap:
            return int(cap)
    except Exception:
        pass
    return 64 * 1024 * 1024   # conservative fallback: v7x per-TC physical VMEM


def kajn_forward(x, params, *, degree=3, a=1.0, b=1.0,
                 block_batch=512, mxu_dtype=jnp.bfloat16):
    """KAJN forward as one fused Pallas call.

    params: list of (base_weights (out,in), jacobi_coeffs (in,out,deg+1)) per
    layer, matching the torch module's parameters.  Returns (flat_batch, out).
    """
    dims = [p[0].shape[1] for p in params] + [params[-1][0].shape[0]]
    in0, out_last = dims[0], dims[-1]

    x2 = jnp.reshape(x, (-1, in0)).astype(jnp.float32)
    batch = x2.shape[0]

    packed = [_pack_layer(bw, jc, degree, mxu_dtype) for bw, jc in params]
    packed_dims = [(int(w.shape[0]), int(w.shape[1])) for w, _ in packed]
    thetas = _jacobi_thetas(degree, float(a), float(b))

    # --- Batch tiling: balanced tiles (padding < 8 rows/tile), sublane aligned,
    # and >= 2 tiles so both v7x TensorCores are used (harmless on v5e/v6e).
    if batch <= 8:
        tb = 8
    else:
        n_tiles = max(_cdiv(batch, block_batch), 2)
        tb = _round_up(_cdiv(batch, n_tiles), 8)

    # --- Chip-aware VMEM budget: cap at 75% of physical VMEM (~48 MiB on v7x,
    # ~96 MiB on v5e/v6e); shrink the batch tile rather than over-request.
    vmem_cap = int(0.75 * _vmem_capacity_bytes())

    def vmem_est(tb_):
        w_bytes = 2 * sum(k * o * 2 for k, o in packed_dims)     # x2: pipeline buffers
        bias_bytes = 2 * len(packed) * 8 * 128 * 4               # (8,128)-padded tiles
        io_bytes = 2 * tb_ * in0 * 4 + 2 * tb_ * out_last * 4    # double-buffered x/out
        live = max((degree + 4) * tb_ * i * 4 + 2 * tb_ * o * 4
                   for i, o in zip(dims[:-1], dims[1:]))         # in-kernel live values
        return w_bytes + bias_bytes + io_bytes + live

    while vmem_est(tb) > vmem_cap and tb > 8:
        tb = max(8, _round_up(tb // 2, 8))

    padded = _round_up(batch, tb)
    if padded != batch:
        x2 = jnp.pad(x2, ((0, padded - batch), (0, 0)))

    est = vmem_est(tb)
    vmem_limit = int(min(est * 1.25, vmem_cap)) if est > 24 * 1024 * 1024 else None

    # --- Specs & operands: x first, then interleaved (w_l, bias_l).
    in_specs = [pl.BlockSpec((tb, in0), lambda i: (i, 0))]
    operands = [x2]
    for (w, bias), (k, o) in zip(packed, packed_dims):
        # Constant block index -> weights/biases stay VMEM-resident across tiles.
        in_specs.append(pl.BlockSpec((k, o), lambda i: (0, 0)))
        in_specs.append(pl.BlockSpec((1, o), lambda i: (0, 0)))
        operands += [w, bias]

    flops = 2 * padded * sum(k * o for k, o in packed_dims)
    transcendentals = 3 * padded * sum(dims[:-1])        # exp + reciprocal + tanh
    bytes_accessed = (padded * in0 * 4 + padded * out_last * 4
                      + sum(k * o * 2 for k, o in packed_dims)
                      + sum(o * 4 for _, o in packed_dims))

    kernel = functools.partial(
        _kajn_fused_kernel, n_layers=len(packed), degree=degree,
        a=float(a), b=float(b), thetas=thetas, mxu_dtype=mxu_dtype)

    out = pl.pallas_call(
        kernel,
        out_shape=jax.ShapeDtypeStruct((padded, out_last), x2.dtype),
        grid_spec=pltpu.PrefetchScalarGridSpec(
            num_scalar_prefetch=0,
            grid=(padded // tb,),
            in_specs=in_specs,
            out_specs=pl.BlockSpec((tb, out_last), lambda i: (i, 0)),
        ),
        compiler_params=pltpu.CompilerParams(
            dimension_semantics=("parallel",),
            vmem_limit_bytes=vmem_limit),
        cost_estimate=pl.CostEstimate(flops=flops,
                                      transcendentals=transcendentals,
                                      bytes_accessed=bytes_accessed),
    )(*operands)

    return out[:batch]


def kajn_reference(x, params, *, degree=3, a=1.0, b=1.0):
    """Pure-JAX f32 reference mirroring the torch module."""
    for base_weights, jacobi_coeffs in params:
        in_dim = base_weights.shape[1]
        xr = jnp.reshape(x, (-1, in_dim)).astype(jnp.float32)
        basis = jax.nn.silu(xr) @ base_weights.T
        t = jnp.tanh(xr)
        ps = [jnp.ones_like(t)]
        if degree > 0:
            ps.append(((a - b) + (a + b + 2.0) * t) / 2.0)
        thetas = _jacobi_thetas(degree, float(a), float(b))
        for i in range(2, degree + 1):
            tk, tk1, tk2 = thetas[i - 2]
            ps.append((tk * t + tk1) * ps[-1] - tk2 * ps[-2])
        jacobi = jnp.stack(ps, axis=-1)                    # (B, in, deg+1)
        x = jnp.einsum('bid,iod->bo', jacobi, jacobi_coeffs) + basis
    return x


if __name__ == "__main__":
    key = jax.random.PRNGKey(0)
    layers_hidden = [16, 64, 64, 32]
    degree, a, b = 3, 1.0, 1.0

    # Parameters with torch-like init: xavier_uniform_ base weights,
    # normal(0, 1/(in*(deg+1))) jacobi coefficients.
    params = []
    for in_f, out_f in zip(layers_hidden[:-1], layers_hidden[1:]):
        key, k_w, k_c = jax.random.split(key, 3)
        limit = math.sqrt(6.0 / (in_f + out_f))
        base_w = jax.random.uniform(k_w, (out_f, in_f), jnp.float32,
                                    -limit, limit)
        coeffs = (jax.random.normal(k_c, (in_f, out_f, degree + 1),
                                    jnp.float32)
                  * (1.0 / (in_f * (degree + 1))))
        params.append((base_w, coeffs))

    key, k_x = jax.random.split(key)
    # 2*4*16*16 = 2048 elements -> flattened batch of 128 rows of width 16.
    x = jax.random.normal(k_x, (2, 4, 16, 16), jnp.float32)

    fwd = jax.jit(functools.partial(kajn_forward, degree=degree, a=a, b=b))
    out = jax.block_until_ready(fwd(x, params))

    expected_shape = (x.size // layers_hidden[0], layers_hidden[-1])
    assert out.shape == expected_shape, (out.shape, expected_shape)

    ref = kajn_reference(x, params, degree=degree, a=a, b=b)
    max_err = float(jnp.max(jnp.abs(out - ref)))
    # bf16 MXU operands vs the pure-f32 reference -> loose tolerance.
    assert jnp.allclose(out, ref, rtol=5e-2, atol=5e-2), f"max_err={max_err}"

    print("KERNEL_OK")
</pallas_src>

<mosaic_0001>
module attributes {stable_mosaic.version = 11 : i64} {
  func.func @_kajn_fused_kernel(%arg0: i32, %arg1: memref<64x16xf32, #tpu.memory_space<vmem>>, %arg2: memref<64x64xbf16, #tpu.memory_space<vmem>>, %arg3: memref<1x64xf32, #tpu.memory_space<vmem>>, %arg4: memref<256x64xbf16, #tpu.memory_space<vmem>>, %arg5: memref<1x64xf32, #tpu.memory_space<vmem>>, %arg6: memref<256x32xbf16, #tpu.memory_space<vmem>>, %arg7: memref<1x32xf32, #tpu.memory_space<vmem>>, %arg8: memref<64x32xf32, #tpu.memory_space<vmem>>) attributes {dimension_semantics = [#tpu.dimension_semantics<parallel>], iteration_bounds = array<i64: 2>, scalar_prefetch = 0 : i64, scratch_operands = 0 : i64, tpu.core_type = #tpu.core_type<tc>, window_params = [{transform_indices = @transform_0, window_bounds = array<i64: 64, 16>}, {pipeline_mode = #tpu.pipeline_mode<synchronous>, transform_indices = @transform_1, window_bounds = array<i64: 64, 64>}, {pipeline_mode = #tpu.pipeline_mode<synchronous>, transform_indices = @transform_2, window_bounds = array<i64: 1, 64>}, {pipeline_mode = #tpu.pipeline_mode<synchronous>, transform_indices = @transform_3, window_bounds = array<i64: 256, 64>}, {pipeline_mode = #tpu.pipeline_mode<synchronous>, transform_indices = @transform_4, window_bounds = array<i64: 1, 64>}, {pipeline_mode = #tpu.pipeline_mode<synchronous>, transform_indices = @transform_5, window_bounds = array<i64: 256, 32>}, {pipeline_mode = #tpu.pipeline_mode<synchronous>, transform_indices = @transform_6, window_bounds = array<i64: 1, 32>}, {transform_indices = @transform_7, window_bounds = array<i64: 64, 32>}]} {
    %c0 = arith.constant 0 : index
    %c0_0 = arith.constant 0 : index
    %0 = vector.load %arg1[%c0, %c0_0] : memref<64x16xf32, #tpu.memory_space<vmem>>, vector<64x16xf32>
    %cst = arith.constant 0.000000e+00 : f32
    %1 = vector.broadcast %cst : f32 to vector<64x16xf32>
    %2 = arith.subf %1, %0 : vector<64x16xf32>
    %3 = math.exp %2 : vector<64x16xf32>
    %cst_1 = arith.constant 1.000000e+00 : f32
    %4 = vector.broadcast %cst_1 : f32 to vector<64x16xf32>
    %5 = arith.addf %4, %3 : vector<64x16xf32>
    %6 = tpu.reciprocal %5 {approx = true} : vector<64x16xf32> -> vector<64x16xf32>
    %7 = arith.mulf %0, %6 : vector<64x16xf32>
    %8 = math.tanh %0 : vector<64x16xf32>
    %cst_2 = arith.constant 1.000000e+00 : f32
    %9 = vector.broadcast %cst_2 : f32 to vector<64x16xf32>
    %cst_3 = arith.constant 4.000000e+00 : f32
    %10 = vector.broadcast %cst_3 : f32 to vector<64x16xf32>
    %11 = arith.mulf %10, %8 : vector<64x16xf32>
    %cst_4 = arith.constant 0.000000e+00 : f32
    %12 = vector.broadcast %cst_4 : f32 to vector<64x16xf32>
    %13 = arith.addf %12, %11 : vector<64x16xf32>
    %cst_5 = arith.constant 5.000000e-01 : f32
    %14 = vector.broadcast %cst_5 : f32 to vector<64x16xf32>
    %15 = arith.mulf %13, %14 : vector<64x16xf32>
    %cst_6 = arith.constant 1.875000e+00 : f32
    %16 = vector.broadcast %cst_6 : f32 to vector<64x16xf32>
    %17 = arith.mulf %16, %8 : vector<64x16xf32>
    %cst_7 = arith.constant 0.000000e+00 : f32
    %18 = vector.broadcast %cst_7 : f32 to vector<64x16xf32>
    %19 = arith.addf %17, %18 : vector<64x16xf32>
    %20 = arith.mulf %19, %15 : vector<64x16xf32>
    %cst_8 = arith.constant 7.500000e-01 : f32
    %21 = vector.broadcast %cst_8 : f32 to vector<64x16xf32>
    %22 = arith.mulf %21, %9 : vector<64x16xf32>
    %23 = arith.subf %20, %22 : vector<64x16xf32>
    %cst_9 = arith.constant 1.86666667 : f32
    %24 = vector.broadcast %cst_9 : f32 to vector<64x16xf32>
    %25 = arith.mulf %24, %8 : vector<64x16xf32>
    %cst_10 = arith.constant 0.000000e+00 : f32
    %26 = vector.broadcast %cst_10 : f32 to vector<64x16xf32>
    %27 = arith.addf %25, %26 : vector<64x16xf32>
    %28 = arith.mulf %27, %23 : vector<64x16xf32>
    %cst_11 = arith.constant 8.000000e-01 : f32
    %29 = vector.broadcast %cst_11 : f32 to vector<64x16xf32>
    %30 = arith.mulf %29, %15 : vector<64x16xf32>
    %31 = arith.subf %28, %30 : vector<64x16xf32>
    %32 = tpu.concatenate %7, %15, %23, %31 in 1 : vector<64x16xf32>, vector<64x16xf32>, vector<64x16xf32>, vector<64x16xf32> -> vector<64x64xf32>
    %33 = arith.truncf %32 : vector<64x64xf32> to vector<64x64xbf16>
    %c0_12 = arith.constant 0 : index
    %c0_13 = arith.constant 0 : index
    %34 = vector.load %arg2[%c0_12, %c0_13] : memref<64x64xbf16, #tpu.memory_space<vmem>>, vector<64x64xbf16>
    %cst_14 = arith.constant dense<0.000000e+00> : vector<64x64xf32>
    %35 = tpu.matmul %33, %34, %cst_14 {dimension_numbers = #tpu.dot_dimension_numbers<[1], [0], [0], [1], [0, 0, 1, 1], [], []>} : vector<64x64xbf16>, vector<64x64xbf16>, vector<64x64xf32> -> vector<64x64xf32>
    %c0_15 = arith.constant 0 : index
    %c0_16 = arith.constant 0 : index
    %36 = vector.load %arg3[%c0_15, %c0_16] : memref<1x64xf32, #tpu.memory_space<vmem>>, vector<1x64xf32>
    %37 = vector.broadcast %36 : vector<1x64xf32> to vector<64x64xf32>
    %38 = arith.addf %35, %37 : vector<64x64xf32>
    %cst_17 = arith.constant 0.000000e+00 : f32
    %39 = vector.broadcast %cst_17 : f32 to vector<64x64xf32>
    %40 = arith.subf %39, %38 : vector<64x64xf32>
    %41 = math.exp %40 : vector<64x64xf32>
    %cst_18 = arith.constant 1.000000e+00 : f32
    %42 = vector.broadcast %cst_18 : f32 to vector<64x64xf32>
    %43 = arith.addf %42, %41 : vector<64x64xf32>
    %44 = tpu.reciprocal %43 {approx = true} : vector<64x64xf32> -> vector<64x64xf32>
    %45 = arith.mulf %38, %44 : vector<64x64xf32>
    %46 = math.tanh %38 : vector<64x64xf32>
    %cst_19 = arith.constant 1.000000e+00 : f32
    %47 = vector.broadcast %cst_19 : f32 to vector<64x64xf32>
    %cst_20 = arith.constant 4.000000e+00 : f32
    %48 = vector.broadcast %cst_20 : f32 to vector<64x64xf32>
    %49 = arith.mulf %48, %46 : vector<64x64xf32>
    %cst_21 = arith.constant 0.000000e+00 : f32
    %50 = vector.broadcast %cst_21 : f32 to vector<64x64xf32>
    %51 = arith.addf %50, %49 : vector<64x64xf32>
    %cst_22 = arith.constant 5.000000e-01 : f32
    %52 = vector.broadcast %cst_22 : f32 to vector<64x64xf32>
    %53 = arith.mulf %51, %52 : vector<64x64xf32>
    %cst_23 = arith.constant 1.875000e+00 : f32
    %54 = vector.broadcast %cst_23 : f32 to vector<64x64xf32>
    %55 = arith.mulf %54, %46 : vector<64x64xf32>
    %cst_24 = arith.constant 0.000000e+00 : f32
    %56 = vector.broadcast %cst_24 : f32 to vector<64x64xf32>
    %57 = arith.addf %55, %56 : vector<64x64xf32>
    %58 = arith.mulf %57, %53 : vector<64x64xf32>
    %cst_25 = arith.constant 7.500000e-01 : f32
    %59 = vector.broadcast %cst_25 : f32 to vector<64x64xf32>
    %60 = arith.mulf %59, %47 : vector<64x64xf32>
    %61 = arith.subf %58, %60 : vector<64x64xf32>
    %cst_26 = arith.constant 1.86666667 : f32
    %62 = vector.broadcast %cst_26 : f32 to vector<64x64xf32>
    %63 = arith.mulf %62, %46 : vector<64x64xf32>
    %cst_27 = arith.constant 0.000000e+00 : f32
    %64 = vector.broadcast %cst_27 : f32 to vector<64x64xf32>
    %65 = arith.addf %63, %64 : vector<64x64xf32>
    %66 = arith.mulf %65, %61 : vector<64x64xf32>
    %cst_28 = arith.constant 8.000000e-01 : f32
    %67 = vector.broadcast %cst_28 : f32 to vector<64x64xf32>
    %68 = arith.mulf %67, %53 : vector<64x64xf32>
    %69 = arith.subf %66, %68 : vector<64x64xf32>
    %70 = tpu.concatenate %45, %53, %61, %69 in 1 : vector<64x64xf32>, vector<64x64xf32>, vector<64x64xf32>, vector<64x64xf32> -> vector<64x256xf32>
    %71 = arith.truncf %70 : vector<64x256xf32> to vector<64x256xbf16>
    %c0_29 = arith.constant 0 : index
    %c0_30 = arith.constant 0 : index
    %72 = vector.load %arg4[%c0_29, %c0_30] : memref<256x64xbf16, #tpu.memory_space<vmem>>, vector<256x64xbf16>
    %cst_31 = arith.constant dense<0.000000e+00> : vector<64x64xf32>
    %73 = tpu.matmul %71, %72, %cst_31 {dimension_numbers = #tpu.dot_dimension_numbers<[1], [0], [0], [1], [0, 0, 1, 1], [], []>} : vector<64x256xbf16>, vector<256x64xbf16>, vector<64x64xf32> -> vector<64x64xf32>
    %c0_32 = arith.constant 0 : index
    %c0_33 = arith.constant 0 : index
    %74 = vector.load %arg5[%c0_32, %c0_33] : memref<1x64xf32, #tpu.memory_space<vmem>>, vector<1x64xf32>
    %75 = vector.broadcast %74 : vector<1x64xf32> to vector<64x64xf32>
    %76 = arith.addf %73, %75 : vector<64x64xf32>
    %cst_34 = arith.constant 0.000000e+00 : f32
    %77 = vector.broadcast %cst_34 : f32 to vector<64x64xf32>
    %78 = arith.subf %77, %76 : vector<64x64xf32>
    %79 = math.exp %78 : vector<64x64xf32>
    %cst_35 = arith.constant 1.000000e+00 : f32
    %80 = vector.broadcast %cst_35 : f32 to vector<64x64xf32>
    %81 = arith.addf %80, %79 : vector<64x64xf32>
    %82 = tpu.reciprocal %81 {approx = true} : vector<64x64xf32> -> vector<64x64xf32>
    %83 = arith.mulf %76, %82 : vector<64x64xf32>
    %84 = math.tanh %76 : vector<64x64xf32>
    %cst_36 = arith.constant 1.000000e+00 : f32
    %85 = vector.broadcast %cst_36 : f32 to vector<64x64xf32>
    %cst_37 = arith.constant 4.000000e+00 : f32
    %86 = vector.broadcast %cst_37 : f32 to vector<64x64xf32>
    %87 = arith.mulf %86, %84 : vector<64x64xf32>
    %cst_38 = arith.constant 0.000000e+00 : f32
    %88 = vector.broadcast %cst_38 : f32 to vector<64x64xf32>
    %89 = arith.addf %88, %87 : vector<64x64xf32>
    %cst_39 = arith.constant 5.000000e-01 : f32
    %90 = vector.broadcast %cst_39 : f32 to vector<64x64xf32>
    %91 = arith.mulf %89, %90 : vector<64x64xf32>
    %cst_40 = arith.constant 1.875000e+00 : f32
    %92 = vector.broadcast %cst_40 : f32 to vector<64x64xf32>
    %93 = arith.mulf %92, %84 : vector<64x64xf32>
    %cst_41 = arith.constant 0.000000e+00 : f32
    %94 = vector.broadcast %cst_41 : f32 to vector<64x64xf32>
    %95 = arith.addf %93, %94 : vector<64x64xf32>
    %96 = arith.mulf %95, %91 : vector<64x64xf32>
    %cst_42 = arith.constant 7.500000e-01 : f32
    %97 = vector.broadcast %cst_42 : f32 to vector<64x64xf32>
    %98 = arith.mulf %97, %85 : vector<64x64xf32>
    %99 = arith.subf %96, %98 : vector<64x64xf32>
    %cst_43 = arith.constant 1.86666667 : f32
    %100 = vector.broadcast %cst_43 : f32 to vector<64x64xf32>
    %101 = arith.mulf %100, %84 : vector<64x64xf32>
    %cst_44 = arith.constant 0.000000e+00 : f32
    %102 = vector.broadcast %cst_44 : f32 to vector<64x64xf32>
    %103 = arith.addf %101, %102 : vector<64x64xf32>
    %104 = arith.mulf %103, %99 : vector<64x64xf32>
    %cst_45 = arith.constant 8.000000e-01 : f32
    %105 = vector.broadcast %cst_45 : f32 to vector<64x64xf32>
    %106 = arith.mulf %105, %91 : vector<64x64xf32>
    %107 = arith.subf %104, %106 : vector<64x64xf32>
    %108 = tpu.concatenate %83, %91, %99, %107 in 1 : vector<64x64xf32>, vector<64x64xf32>, vector<64x64xf32>, vector<64x64xf32> -> vector<64x256xf32>
    %109 = arith.truncf %108 : vector<64x256xf32> to vector<64x256xbf16>
    %c0_46 = arith.constant 0 : index
    %c0_47 = arith.constant 0 : index
    %110 = vector.load %arg6[%c0_46, %c0_47] : memref<256x32xbf16, #tpu.memory_space<vmem>>, vector<256x32xbf16>
    %cst_48 = arith.constant dense<0.000000e+00> : vector<64x32xf32>
    %111 = tpu.matmul %109, %110, %cst_48 {dimension_numbers = #tpu.dot_dimension_numbers<[1], [0], [0], [1], [0, 0, 1, 1], [], []>} : vector<64x256xbf16>, vector<256x32xbf16>, vector<64x32xf32> -> vector<64x32xf32>
    %c0_49 = arith.constant 0 : index
    %c0_50 = arith.constant 0 : index
    %112 = vector.load %arg7[%c0_49, %c0_50] : memref<1x32xf32, #tpu.memory_space<vmem>>, vector<1x32xf32>
    %113 = vector.broadcast %112 : vector<1x32xf32> to vector<64x32xf32>
    %114 = arith.addf %111, %113 : vector<64x32xf32>
    %c0_51 = arith.constant 0 : index
    %c0_52 = arith.constant 0 : index
    %115 = vector.load %arg8[%c0_51, %c0_52] : memref<64x32xf32, #tpu.memory_space<vmem>>, vector<64x32xf32>
    tpu.vector_store %arg8[%c0_51, %c0_52], %114 {strides = array<i32>} : memref<64x32xf32, #tpu.memory_space<vmem>>, vector<64x32xf32>,
    return
  }
  func.func @transform_0(%arg0: i32) -> (i32, i32) {
    %c0_i32 = arith.constant 0 : i32
    %c0_i32_0 = arith.constant 0 : i32
    return %arg0, %c0_i32 : i32, i32
  }
  func.func @transform_1(%arg0: i32) -> (i32, i32) {
    %c0_i32 = arith.constant 0 : i32
    %c0_i32_0 = arith.constant 0 : i32
    %c0_i32_1 = arith.constant 0 : i32
    return %c0_i32, %c0_i32_0 : i32, i32
  }
  func.func @transform_2(%arg0: i32) -> (i32, i32) {
    %c0_i32 = arith.constant 0 : i32
    %c0_i32_0 = arith.constant 0 : i32
    %c0_i32_1 = arith.constant 0 : i32
    return %c0_i32, %c0_i32_0 : i32, i32
  }
  func.func @transform_3(%arg0: i32) -> (i32, i32) {
    %c0_i32 = arith.constant 0 : i32
    %c0_i32_0 = arith.constant 0 : i32
    %c0_i32_1 = arith.constant 0 : i32
    return %c0_i32, %c0_i32_0 : i32, i32
  }
  func.func @transform_4(%arg0: i32) -> (i32, i32) {
    %c0_i32 = arith.constant 0 : i32
    %c0_i32_0 = arith.constant 0 : i32
    %c0_i32_1 = arith.constant 0 : i32
    return %c0_i32, %c0_i32_0 : i32, i32
  }
  func.func @transform_5(%arg0: i32) -> (i32, i32) {
    %c0_i32 = arith.constant 0 : i32
    %c0_i32_0 = arith.constant 0 : i32
    %c0_i32_1 = arith.constant 0 : i32
    return %c0_i32, %c0_i32_0 : i32, i32
  }
  func.func @transform_6(%arg0: i32) -> (i32, i32) {
    %c0_i32 = arith.constant 0 : i32
    %c0_i32_0 = arith.constant 0 : i32
    %c0_i32_1 = arith.constant 0 : i32
    return %c0_i32, %c0_i32_0 : i32, i32
  }
  func.func @transform_7(%arg0: i32) -> (i32, i32) {
    %c0_i32 = arith.constant 0 : i32
    %c0_i32_0 = arith.constant 0 : i32
    return %arg0, %c0_i32 : i32, i32
  }
}

</mosaic_0001>

<bundles_post_ra>
// kernel: kajn_forward.1
= control target key start
LH: loop header
LB: loop body
LE: loop exit
PB: predicated region body
PF: predicated region fallthrough
CT: control target
= control target key end

     0   :  { %s2213_s24 = smov 0   ;;  %s2654_s0 = inlined_call_operand.vmem [shape: f32[128,16], index: 0, kind: input, shape index: {}]   ;;  %s2655_s1 = inlined_call_operand.vmem [shape: bf16[64,64], index: 1, kind: input, shape index: {}]   ;;  %s2656_s2 = inlined_call_operand.vmem [shape: f32[1,64], index: 2, kind: input, shape index: {}]   ;;  %s2657_s3 = inlined_call_operand.vmem [shape: bf16[256,64], index: 3, kind: input, shape index: {}]   ;;  %s2658_s4 = inlined_call_operand.vmem [shape: f32[1,64], index: 4, kind: input, shape index: {}]   ;;  %s2659_s5 = inlined_call_operand.vmem [shape: bf16[256,32], index: 5, kind: input, shape index: {}]   ;;  %s2660_s6 = inlined_call_operand.vmem [shape: f32[1,32], index: 6, kind: input, shape index: {}]   ;;  %s2661_s7 = inlined_call_operand.vmem [shape: f32[128,32], index: 7, kind: output, shape index: {}]  }
   0x1 LB: > { %s1631_s25 = sadd.s32 4294967295, %s2167_s24   ;;  %p1635_p0 = scmp.ge.s32.totalorder %s2167_s24, 1  ;;  %s2167_s24 = sphi %s2213_s24, %s17_s24  }
   0x2   : > { %p238_p1 = scmp.lt.s32.totalorder %s2167_s24, 3 }
   0x4   : > { %p239_p2 = pnand %p1635_p0, %p238_p1 }
   0x5   : > { %s1636_s26 = sshll.u32 (!%p239_p2), %s1631_s25, 3  ;;  %v1981_v8 = vld [vmem:[%s2655_s1] sm:$0xff] (!%p239_p2)   ;;  %v1982_v9 = vld [vmem:[%s2655_s1 + $0x8] sm:$0xff] (!%p239_p2)   ;;  %v1983_v18 = vld [vmem:[%s2655_s1 + $0x10] sm:$0xff] (!%p239_p2)   ;;  %s2169_s16 = smov (!%p239_p2), 16   ;;  %vm539_vm0 = vcmask (!%p239_p2), 130048  }
   0x6   : > { %242 = sbr.rel (%p239_p2) target bundleno = 1142 (0x476), region = 48  ;;  %p271_p3 = scmp.lt.s32.totalorder (!%p239_p2), %s1636_s26, 15  ;;  %1797 = vmatprep.subr.bf16.mxu0 (!%p239_p2), %v1981_v8  ;;  %v1984_v38 = vld [vmem:[%s2655_s1 + $0x18] sm:$0xff] (!%p239_p2)   ;;  %vm548_vm1 = vcmask (!%p239_p2), 261120   ;;  %vm557_vm2 = vcmask (!%p239_p2), 392192   ;;  %vm609_vm3 = vcmask (!%p239_p2), 523264  }
   0x7   : > { %1798 = vmatpush3.bf16.msra.mxu0 (!%p239_p2), %v1981_v8  ;;  %s2170_s17 = smov (!%p239_p2), 32   ;;  %s2171_s18 = smov (!%p239_p2), 48  }
   0x8   : > { %1799 = vmatprep.subr.bf16.mxu0 (!%p239_p2), %v1982_v9  ;;  %s2172_s13 = smov (!%p239_p2), 64  }
   0xb   : > { %1800 = vmatpush3.bf16.msra.mxu0 (!%p239_p2), %v1982_v9 }
   0xc   : > { %1801 = vmatprep.subr.bf16.mxu0 (!%p239_p2), %v1983_v18 }
   0xd   : > { %s2663_s26 = smov (!%p271_p3, %s1636_s26), 15 }
   0xe   : > { %s1637_s27 = sshll.u32 %s2663_s26, 3 }
   0xf   : > { %s274_s30 = scalar_lea.vmem %s2654_s0, %s1637_s27  ;;  %1802 = vmatpush3.bf16.msra.mxu0 %v1983_v18  ;;  %s2633_s12 = scalar_lea.vmem %s2661_s7, %s1637_s27 }
  0x10   : > { %v2229_v0 = vld [vmem:[%s274_s30] sm:$0xff]  ;;  %v2231_v1 = vld [vmem:[%s274_s30 + $0x8] sm:$0xff]  ;;  %v2233_v2 = vld [vmem:[%s274_s30 + $0x10] sm:$0xff]  ;;  %1803 = vmatprep.subr.bf16.mxu0 %v1984_v38 }
  0x11   : > { %2017 = vtanh.f32 %v2229_v0  ;;  %v2236_v3 = vld [vmem:[%s274_s30 + $0x18] sm:$0xff]  ;;  %v2239_v4 = vld [vmem:[%s274_s30 + $0x20] sm:$0xff]  ;;  %v2242_v5 = vld [vmem:[%s274_s30 + $0x28] sm:$0xff] }
  0x12   : > { %2019 = vtanh.f32 %v2231_v1  ;;  %v2245_v6 = vld [vmem:[%s274_s30 + $0x30] sm:$0xff]  ;;  %v2248_v7 = vld [vmem:[%s274_s30 + $0x38] sm:$0xff] }
  0x13   : > { %2021 = vtanh.f32 %v2233_v2  ;;  %1804 = vmatpush3.bf16.msra.mxu0 %v1984_v38 }
  0x14   : > { %2023 = vtanh.f32 %v2236_v3 }
  0x15   : > { %2025 = vtanh.f32 %v2239_v4 }
  0x16   : > { %2027 = vtanh.f32 %v2242_v5 }
  0x17   : > { %2029 = vtanh.f32 %v2245_v6 }
  0x18   : > { %2031 = vtanh.f32 %v2248_v7 }
  0x1b   : > { %v2018_v10 = vpop.eup %2017 }
  0x1c   : > { %v2020_v11 = vpop.eup %2019  ;;  %v347_v12 = vmul.f32 4.0, %v2018_v10  ;;  %v371_v13 = vmul.f32 1.875, %v2018_v10  ;;  %v403_v17 = vmul.f32 1.8666667, %v2018_v10 }
  0x1d   : > { %v2022_v14 = vpop.eup %2021  ;;  %v348_v15 = vmul.f32 4.0, %v2020_v11  ;;  %v372_v16 = vmul.f32 1.875, %v2020_v11  ;;  %v404_v22 = vmul.f32 1.8666667, %v2020_v11 }
  0x1e   : > { %v2024_v19 = vpop.eup %2023  ;;  %v363_v20 = vmul.f32 0.5, %v347_v12  ;;  %v349_v21 = vmul.f32 4.0, %v2022_v14  ;;  %v373_v23 = vmul.f32 1.875, %v2022_v14  ;;  %v405_v28 = vmul.f32 1.8666667, %v2022_v14 }
  0x1f   : > { %v2026_v24 = vpop.eup %2025  ;;  %v364_v25 = vmul.f32 0.5, %v348_v15  ;;  %v350_v26 = vmul.f32 4.0, %v2024_v19  ;;  %v374_v27 = vmul.f32 1.875, %v2024_v19  ;;  %v406_v32 = vmul.f32 1.8666667, %v2024_v19 }
  0x20   : > { %v2028_v29 = vpop.eup %2027  ;;  %v365_v30 = vmul.f32 0.5, %v349_v21  ;;  %v387_v31 = vmul.f32 %v371_v13, %v363_v20  ;;  %v351_v33 = vmul.f32 4.0, %v2026_v24  ;;  %v427_v37 = vmul.f32 0.8, %v363_v20 }
  0x21   : > { %v1841_v34 = vpack.i.bf16 %v364_v25, %v363_v20  ;;  %v366_v35 = vmul.f32 0.5, %v350_v26  ;;  %v388_v36 = vmul.f32 %v372_v16, %v364_v25  ;;  %v2030_v39 = vpop.eup %2029  ;;  %v428_v42 = vmul.f32 0.8, %v364_v25 }
  0x22   : > { %v1640_v40 = vadd.f32 -0.75, %v387_v31  ;;  %v389_v41 = vmul.f32 %v373_v23, %v365_v30  ;;  %v352_v43 = vmul.f32 4.0, %v2028_v29  ;;  %v2032_v44 = vpop.eup %2031  ;;  %v429_v48 = vmul.f32 0.8, %v365_v30 }
  0x23   : > { %1842 = vrot.lane.b32.xlu0 %v1841_v34, %s2169_s16  ;;  %v1846_v45 = vpack.i.bf16 %v366_v35, %v365_v30  ;;  %v1641_v46 = vadd.f32 -0.75, %v388_v36  ;;  %v390_v47 = vmul.f32 %v374_v27, %v366_v35  ;;  %v430_v51 = vmul.f32 0.8, %v366_v35 }
  0x24   : > { %v419_v49 = vmul.f32 %v1640_v40, %v403_v17  ;;  %v1642_v50 = vadd.f32 -0.75, %v389_v41  ;;  %v367_v52 = vmul.f32 0.5, %v351_v33  ;;  %v353_v56 = vmul.f32 4.0, %v2030_v39 }
  0x25   : > { %v420_v53 = vmul.f32 %v1641_v46, %v404_v22  ;;  %v1851_v54 = vpack.i.bf16 %v1641_v46, %v1640_v40  ;;  %v1643_v55 = vadd.f32 -0.75, %v390_v47  ;;  %v368_v59 = vmul.f32 0.5, %v352_v43 }
  0x26   : > { %v435_v57 = vsub.f32 %v419_v49, %v427_v37  ;;  %v421_v58 = vmul.f32 %v1642_v50, %v405_v28  ;;  %v354_v60 = vmul.f32 4.0, %v2032_v44  ;;  %v369_v8 = vmul.f32 0.5, %v353_v56 }
  0x27   : > { %1847 = vrot.lane.b32.xlu0 %v1846_v45, %s2169_s16  ;;  %1852 = vrot.lane.b32.xlu1 %v1851_v54, %s2170_s17  ;;  %v1856_v61 = vpack.i.bf16 %v1643_v55, %v1642_v50  ;;  %v436_v62 = vsub.f32 %v420_v53, %v428_v42  ;;  %v422_v63 = vmul.f32 %v1643_v55, %v406_v32  ;;  %v375_v11 = vmul.f32 1.875, %v2026_v24 }
  0x28   : > { %v437_v9 = vsub.f32 %v421_v58, %v429_v48  ;;  %v370_v10 = vmul.f32 0.5, %v354_v60  ;;  %v376_v12 = vmul.f32 1.875, %v2028_v29  ;;  %v377_v15 = vmul.f32 1.875, %v2030_v39 }
  0x29   : > { %v1861_v13 = vpack.i.bf16 %v436_v62, %v435_v57  ;;  %v438_v14 = vsub.f32 %v422_v63, %v430_v51  ;;  %v378_v16 = vmul.f32 1.875, %v2032_v44  ;;  %v1871_v17 = vpack.i.bf16 %v368_v59, %v367_v52 }
  0x2a   : > { %v391_v18 = vmul.f32 %v375_v11, %v367_v52  ;;  %v392_v19 = vmul.f32 %v376_v12, %v368_v59  ;;  %v407_v20 = vmul.f32 1.8666667, %v2026_v24  ;;  %v393_v22 = vmul.f32 %v377_v15, %v369_v8 }
  0x2b   : > { %1857 = vrot.lane.b32.xlu1 %v1856_v61, %s2170_s17  ;;  %1862 = vrot.lane.b32.xlu0 %v1861_v13, %s2171_s18  ;;  %v1866_v21 = vpack.i.bf16 %v438_v14, %v437_v9  ;;  %v394_v23 = vmul.f32 %v378_v16, %v370_v10  ;;  %v408_v25 = vmul.f32 1.8666667, %v2028_v29  ;;  %v431_v28 = vmul.f32 0.8, %v367_v52 }
  0x2c   : > { %v1644_v26 = vadd.f32 -0.75, %v391_v18  ;;  %v1645_v27 = vadd.f32 -0.75, %v392_v19  ;;  %v432_v30 = vmul.f32 0.8, %v368_v59  ;;  %v1646_v31 = vadd.f32 -0.75, %v393_v22 }
  0x2d   : > { %v1647_v32 = vadd.f32 -0.75, %v394_v23  ;;  %v409_v33 = vmul.f32 1.8666667, %v2030_v39  ;;  %v410_v34 = vmul.f32 1.8666667, %v2032_v44  ;;  %v1876_v35 = vpack.i.bf16 %v370_v10, %v369_v8 }
  0x2e   : > { %v423_v36 = vmul.f32 %v1644_v26, %v407_v20  ;;  %v424_v24 = vmul.f32 %v1645_v27, %v408_v25  ;;  %v433_v37 = vmul.f32 0.8, %v369_v8  ;;  %v1881_v38 = vpack.i.bf16 %v1645_v27, %v1644_v26 }
  0x2f   : > { %1867 = vrot.lane.b32.xlu1 %v1866_v21, %s2171_s18  ;;  %1872 = vrot.lane.b32.xlu0 %v1871_v17, %s2169_s16  ;;  %v425_v40 = vmul.f32 %v1646_v31, %v409_v33  ;;  %v426_v41 = vmul.f32 %v1647_v32, %v410_v34  ;;  %v434_v29 = vmul.f32 0.8, %v370_v10  ;;  %v1886_v45 = vpack.i.bf16 %v1647_v32, %v1646_v31 }
  0x30   : > { %v439_v42 = vsub.f32 %v423_v36, %v431_v28  ;;  %v440_v43 = vsub.f32 %v424_v24, %v432_v30  ;;  %v292_v48 = vsub.f32 0.0, %v2231_v1  ;;  %v291_v49 = vsub.f32 0.0, %v2229_v0 }
  0x31   : > { %v441_v44 = vsub.f32 %v425_v40, %v433_v37  ;;  %v442_v46 = vsub.f32 %v426_v41, %v434_v29  ;;  %v293_v51 = vsub.f32 0.0, %v2233_v2  ;;  %v294_v52 = vsub.f32 0.0, %v2236_v3 }
  0x32   : > { %v1891_v39 = vpack.i.bf16 %v440_v43, %v439_v42  ;;  %v301_v50 = vmul.f32 1.442695, %v292_v48  ;;  %v299_v53 = vmul.f32 1.442695, %v291_v49  ;;  %v295_v56 = vsub.f32 0.0, %v2239_v4 }
  0x33   : > { %1877 = vrot.lane.b32.xlu1 %v1876_v35, %s2169_s16  ;;  %1882 = vrot.lane.b32.xlu0 %v1881_v38, %s2170_s17  ;;  %v1896_v47 = vpack.i.bf16 %v442_v46, %v441_v44  ;;  %v303_v54 = vmul.f32 1.442695, %v293_v51  ;;  %v305_v55 = vmul.f32 1.442695, %v294_v52  ;;  %v296_v57 = vsub.f32 0.0, %v2242_v5 }
  0x34   : > { %2033 = vpow2.f32 %v301_v50  ;;  %v307_v58 = vmul.f32 1.442695, %v295_v56  ;;  %v297_v61 = vsub.f32 0.0, %v2245_v6  ;;  %v298_v62 = vsub.f32 0.0, %v2248_v7 }
  0x35   : > { %2035 = vpow2.f32 %v299_v53  ;;  %v309_v59 = vmul.f32 1.442695, %v296_v57 }
  0x36   : > { %2037 = vpow2.f32 %v303_v54  ;;  %v311_v9 = vmul.f32 1.442695, %v297_v61  ;;  %v313_v11 = vmul.f32 1.442695, %v298_v62 }
  0x37   : > { %1887 = vrot.lane.b32.xlu1 %v1886_v45, %s2170_s17  ;;  %1892 = vrot.lane.b32.xlu0 %v1891_v39, %s2171_s18  ;;  %2039 = vpow2.f32 %v305_v55 }
  0x38   : > { %2041 = vpow2.f32 %v307_v58 }
  0x39   : > { %2043 = vpow2.f32 %v309_v59 }
  0x3b   : > { %1897 = vrot.lane.b32.xlu1 %v1896_v47, %s2171_s18 }
  0x3e   : > { %v2034_v60 = vpop.eup %2033 }
  0x3f   : > { %v2036_v63 = vpop.eup %2035  ;;  %v316_v8 = vadd.f32 1.0, %v2034_v60 }
  0x40   : > { %v2038_v10 = vpop.eup %2037  ;;  %v315_v13 = vadd.f32 1.0, %v2036_v63 }
  0x41   : > { %v2040_v12 = vpop.eup %2039  ;;  %2045 = vrcp.f32 %v316_v8  ;;  %v317_v14 = vadd.f32 1.0, %v2038_v10 }
  0x42   : > { %2047 = vpow2.f32 %v311_v9  ;;  %v318_v15 = vadd.f32 1.0, %v2040_v12  ;;  %v2042_v16 = vpop.eup %2041 }
  0x43   : > { %2049 = vpow2.f32 %v313_v11  ;;  %v2044_v17 = vpop.eup %2043  ;;  %v319_v18 = vadd.f32 1.0, %v2042_v16 }
  0x44   : > { %2051 = vrcp.f32 %v315_v13  ;;  %v320_v19 = vadd.f32 1.0, %v2044_v17 }
  0x45   : > { %2053 = vrcp.f32 %v317_v14 }
  0x46   : > { %2055 = vrcp.f32 %v318_v15 }
  0x47   : > { %2057 = vrcp.f32 %v319_v18 }
  0x48   : > { %2059 = vrcp.f32 %v320_v19 }
  0x4b   : > { %v2046_v20 = vpop.eup %2045 }
  0x4c   : > { %v2048_v21 = vpop.eup %2047  ;;  %v332_v31 = vmul.f32 %v2046_v20, %v2231_v1 }
  0x4d   : > { %v2050_v22 = vpop.eup %2049  ;;  %v321_v26 = vadd.f32 1.0, %v2048_v21 }
  0x4e   : > { %v2052_v23 = vpop.eup %2051  ;;  %v322_v28 = vadd.f32 1.0, %v2050_v22 }
  0x4f   : > { %v2054_v27 = vpop.eup %2053  ;;  %v331_v34 = vmul.f32 %v2052_v23, %v2229_v0  ;;  %2061 = vrcp.f32 %v321_v26 }
  0x50   : > { %v2056_v30 = vpop.eup %2055  ;;  %v333_v24 = vmul.f32 %v2054_v27, %v2233_v2  ;;  %2063 = vrcp.f32 %v322_v28 }
  0x51   : > { %v334_v37 = vmul.f32 %v2056_v30, %v2236_v3  ;;  %v2058_v43 = vpop.eup %2057 }
  0x52   : > { %v2060_v39 = vpop.eup %2059  ;;  %v335_v54 = vmul.f32 %v2058_v43, %v2239_v4  ;;  %v1988_v43 = vld [vmem:[%s2657_s3 + $0x8] sm:$0xff]  }
  0x53   : > { %v336_v55 = vmul.f32 %v2060_v39, %v2242_v5  ;;  %v1991_v39 = vld [vmem:[%s2657_s3 + $0x58] sm:$0xff]  }
  0x59   : > { %v2062_v8 = vpop.eup %2061 }
  0x5a   : > { %v2064_v4 = vpop.eup %2063  ;;  %v337_v17 = vmul.f32 %v2062_v8, %v2245_v6 }
  0x5b   : > { %v338_v18 = vmul.f32 %v2064_v4, %v2248_v7  ;;  %v1997_v4 = vld [vmem:[%s2657_s3 + $0x70] sm:$0xff]  }
  0x95   : > { %v1843_v25 = vpop.permute.xlu0 %1842 }
  0x96   : > { %v1845_v32 = vunpack.i.h.bf16 %v1843_v25  ;;  %v1844_v33 = vunpack.i.l.bf16 %v1843_v25 }
  0x98   : > { %v541_v41 = vsel %vm539_vm0, %v332_v31, %v1845_v32  ;;  %v540_v1 = vsel %vm539_vm0, %v331_v34, %v1844_v33 }
  0x99   : > { %v1848_v35 = vpop.permute.xlu0 %1847  ;;  %v1853_v36 = vpop.permute.xlu1 %1852 }
  0x9a   : > { %v1855_v38 = vunpack.i.h.bf16 %v1853_v36  ;;  %v1854_v40 = vunpack.i.l.bf16 %v1853_v36  ;;  %v1850_v29 = vunpack.i.h.bf16 %v1848_v35  ;;  %v1849_v42 = vunpack.i.l.bf16 %v1848_v35 }
  0x9c   : > { %v549_v3 = vsel %vm548_vm1, %v540_v1, %v1854_v40  ;;  %v550_v48 = vsel %vm548_vm1, %v541_v41, %v1855_v38  ;;  %v543_v49 = vsel %vm539_vm0, %v334_v37, %v1850_v29  ;;  %v542_v50 = vsel %vm539_vm0, %v333_v24, %v1849_v42  ;;  %v1985_v1 = vld [vmem:[%s2657_s3 + $0x40] sm:$0xff]   ;;  %v1987_v42 = vld [vmem:[%s2657_s3 + $0x48] sm:$0xff]  }
  0x9d   : > { %v1858_v0 = vpop.permute.xlu1 %1857  ;;  %v1863_v45 = vpop.permute.xlu0 %1862  ;;  %v1986_v29 = vld [vmem:[%s2657_s3] sm:$0xff]   ;;  %1717 = vmatprep.subr.bf16.mxu1 %v1985_v1 }
  0x9e   : > { %v1865_v44 = vunpack.i.h.bf16 %v1863_v45  ;;  %v1864_v2 = vunpack.i.l.bf16 %v1863_v45  ;;  %v1860_v46 = vunpack.i.h.bf16 %v1858_v0  ;;  %v1859_v47 = vunpack.i.l.bf16 %v1858_v0  ;;  %1718 = vmatpush3.bf16.msra.mxu1 %v1986_v29  ;;  %v1989_v0 = vld [vmem:[%s2657_s3 + $0x50] sm:$0xff]  }
  0x9f   : > { %1719 = vmatprep.subr.bf16.mxu1 %v1987_v42  ;;  %v1990_v45 = vld [vmem:[%s2657_s3 + $0x10] sm:$0xff]  }
  0xa0   : > { %v558_v51 = vsel %vm557_vm2, %v549_v3, %v1864_v2  ;;  %v559_v52 = vsel %vm557_vm2, %v550_v48, %v1865_v44  ;;  %v552_v62 = vsel %vm548_vm1, %v543_v49, %v1860_v46  ;;  %v551_v63 = vsel %vm548_vm1, %v542_v50, %v1859_v47  ;;  %v1992_v44 = vld [vmem:[%s2657_s3 + $0x18] sm:$0xff]   ;;  %v1993_v2 = vld [vmem:[%s2657_s3 + $0x60] sm:$0xff]  }
  0xa1   : > { %v1868_v53 = vpop.permute.xlu1 %1867  ;;  %v1873_v56 = vpop.permute.xlu0 %1872  ;;  %v566_v57 = vpack.c.bf16 %v559_v52, %v558_v51  ;;  %v1994_v46 = vld [vmem:[%s2657_s3 + $0x20] sm:$0xff]  }
  0xa2   : > { %v1870_v58 = vunpack.i.h.bf16 %v1868_v53  ;;  %v1869_v59 = vunpack.i.l.bf16 %v1868_v53  ;;  %v1875_v60 = vunpack.i.h.bf16 %v1873_v56  ;;  %v1874_v61 = vunpack.i.l.bf16 %v1873_v56  ;;  %1720 = vmatpush3.bf16.msra.mxu1 %v1988_v43  ;;  %v1648_v47 = vld [vmem:[%s2656_s2] ss:$0 sm:$0xff]  ;;  %v1996_v56 = vld [vmem:[%s2657_s3 + $0x28] sm:$0xff]  }
  0xa3   : > { %1805 = vmatprep.mubr.msk.bf16.mxu0 %vm609_vm3, %v566_v57  ;;  %1721 = vmatprep.subr.bf16.mxu1 %v1989_v0 }
  0xa4   : > { %v560_v9 = vsel %vm557_vm2, %v551_v63, %v1869_v59  ;;  %v561_v10 = vsel %vm557_vm2, %v552_v62, %v1870_v58  ;;  %v545_v13 = vsel %vm539_vm0, %v336_v55, %v1875_v60  ;;  %v544_v14 = vsel %vm539_vm0, %v335_v54, %v1874_v61  ;;  %v1995_v55 = vld [vmem:[%s2657_s3 + $0x68] sm:$0xff]  }
  0xa5   : > { %v567_v11 = vpack.c.bf16 %v561_v10, %v560_v9  ;;  %v1878_v5 = vpop.permute.xlu1 %1877  ;;  %v1883_v12 = vpop.permute.xlu0 %1882 }
  0xa6   : > { %v1885_v15 = vunpack.i.h.bf16 %v1883_v12  ;;  %v1884_v16 = vunpack.i.l.bf16 %v1883_v12  ;;  %v1880_v19 = vunpack.i.h.bf16 %v1878_v5  ;;  %v1879_v20 = vunpack.i.l.bf16 %v1878_v5  ;;  %1722 = vmatpush3.bf16.msra.mxu1 %v1990_v45 }
  0xa7   : > { %1806 = vmatmul.mubr.msk.bf16.vlgmr.msra.gmra.mrb[0].mxu0 %vm609_vm3, %v567_v11  ;;  %1723 = vmatprep.subr.bf16.mxu1 %v1991_v39  ;;  %v1998_v11 = vld [vmem:[%s2657_s3 + $0x30] sm:$0xff]  }
  0xa8   : > { %v553_v21 = vsel %vm548_vm1, %v544_v14, %v1884_v16  ;;  %v554_v22 = vsel %vm548_vm1, %v545_v13, %v1885_v15  ;;  %v547_v31 = vsel %vm539_vm0, %v338_v18, %v1880_v19  ;;  %v546_v32 = vsel %vm539_vm0, %v337_v17, %v1879_v20 }
  0xa9   : > { %v1888_v23 = vpop.permute.xlu1 %1887  ;;  %v1893_v25 = vpop.permute.xlu0 %1892 }
  0xaa   : > { %v1895_v26 = vunpack.i.h.bf16 %v1893_v25  ;;  %v1894_v27 = vunpack.i.l.bf16 %v1893_v25  ;;  %v1890_v28 = vunpack.i.h.bf16 %v1888_v23  ;;  %v1889_v30 = vunpack.i.l.bf16 %v1888_v23  ;;  %1724 = vmatpush3.bf16.msra.mxu1 %v1992_v44 }
  0xab   : > { %1725 = vmatprep.subr.bf16.mxu1 %v1993_v2 }
  0xac   : > { %v562_v6 = vsel %vm557_vm2, %v553_v21, %v1894_v27  ;;  %v563_v7 = vsel %vm557_vm2, %v554_v22, %v1895_v26  ;;  %v555_v24 = vsel %vm548_vm1, %v546_v32, %v1889_v30  ;;  %v556_v37 = vsel %vm548_vm1, %v547_v31, %v1890_v28  ;;  %v1999_v21 = vld [vmem:[%s2657_s3 + $0x78] sm:$0xff]  }
  0xad   : > { %v568_v33 = vpack.c.bf16 %v563_v7, %v562_v6  ;;  %v1898_v34 = vpop.permute.xlu1 %1897  ;;  %v2000_v22 = vld [vmem:[%s2657_s3 + $0x38] sm:$0xff]  }
  0xae   : > { %v1900_v35 = vunpack.i.h.bf16 %v1898_v34  ;;  %v1899_v36 = vunpack.i.l.bf16 %v1898_v34  ;;  %1726 = vmatpush3.bf16.msra.mxu1 %v1994_v46 }
  0xaf   : > { %1809 = vmatprep.mubr.msk.bf16.mxu0 %vm609_vm3, %v568_v33  ;;  %1727 = vmatprep.subr.bf16.mxu1 %v1995_v55 }
  0xb0   : > { %v564_v38 = vsel %vm557_vm2, %v555_v24, %v1899_v36  ;;  %v565_v40 = vsel %vm557_vm2, %v556_v37, %v1900_v35 }
  0xb1   : > { %v569_v41 = vpack.c.bf16 %v565_v40, %v564_v38 }
  0xb2   : > { %1728 = vmatpush3.bf16.msra.mxu1 %v1996_v56 }
  0xb3   : > { %1810 = vmatmul.mubr.msk.bf16.gmra.mrb[4].mxu0 %vm609_vm3, %v569_v41  ;;  %1729 = vmatprep.subr.bf16.mxu1 %v1997_v4 }
  0xb6   : > { %1730 = vmatpush3.bf16.msra.mxu1 %v1998_v11 }
  0xb7   : > { %1731 = vmatprep.subr.bf16.mxu1 %v1999_v21 }
  0xba   : > { %1732 = vmatpush3.bf16.msra.mxu1 %v2000_v22 }
 0x17a   : > { %v1807_v3 = vpop.f32.mrb[0].mxu0 }
 0x17b   : > { %v2354_v48 = vadd.f32 %v1807_v3, %v1648_v47  ;;  %v656_v49 = vpop.f32.mrb[1].mxu0 }
 0x17c   : > { %v2356_v50 = vadd.f32 %v1648_v47, %v656_v49  ;;  %v1808_v51 = vpop.f32.mrb[2].mxu0 }
 0x17d   : > { %2065 = vtanh.f32 %v2354_v48  ;;  %v2359_v52 = vadd.f32 %v1808_v51, %v1648_v47  ;;  %v659_v53 = vpop.f32.mrb[3].mxu0 }
 0x17e   : > { %2067 = vtanh.f32 %v2356_v50  ;;  %v2362_v54 = vadd.f32 %v1648_v47, %v659_v53 }
 0x17f   : > { %2069 = vtanh.f32 %v2359_v52 }
 0x180   : > { %2071 = vtanh.f32 %v2362_v54 }
 0x186   : > { %v1811_v57 = vpop.f32.mrb[4].mxu0 }
 0x187   : > { %v2066_v58 = vpop.eup %2065  ;;  %v2372_v59 = vadd.f32 %v1811_v57, %v1648_v47  ;;  %v672_v60 = vpop.f32.mrb[5].mxu0 }
 0x188   : > { %v2068_v61 = vpop.eup %2067  ;;  %v2374_v62 = vadd.f32 %v1648_v47, %v672_v60  ;;  %v1812_v63 = vpop.f32.mrb[6].mxu0  ;;  %v745_v15 = vmul.f32 4.0, %v2066_v58  ;;  %v769_v28 = vmul.f32 1.875, %v2066_v58  ;;  %v801_v33 = vmul.f32 1.8666667, %v2066_v58 }
 0x189   : > { %v2070_v8 = vpop.eup %2069  ;;  %2073 = vtanh.f32 %v2372_v59  ;;  %v2377_v9 = vadd.f32 %v1812_v63, %v1648_v47  ;;  %v675_v10 = vpop.f32.mrb[7].mxu0  ;;  %v743_v13 = vmul.f32 4.0, %v2068_v61  ;;  %v767_v25 = vmul.f32 1.875, %v2068_v61 }
 0x18a   : > { %v2072_v5 = vpop.eup %2071  ;;  %2075 = vtanh.f32 %v2374_v62  ;;  %v2386_v12 = vadd.f32 %v1648_v47, %v675_v10  ;;  %v746_v16 = vmul.f32 4.0, %v2070_v8  ;;  %v761_v19 = vmul.f32 0.5, %v745_v15 }
 0x18b   : > { %2077 = vtanh.f32 %v2377_v9  ;;  %v744_v14 = vmul.f32 4.0, %v2072_v5  ;;  %v759_v17 = vmul.f32 0.5, %v743_v13  ;;  %v768_v26 = vmul.f32 1.875, %v2072_v5 }
 0x18c   : > { %2079 = vtanh.f32 %v2386_v12  ;;  %v762_v20 = vmul.f32 0.5, %v746_v16  ;;  %v770_v6 = vmul.f32 1.875, %v2070_v8  ;;  %v785_v7 = vmul.f32 %v769_v28, %v761_v19 }
 0x18d   : > { %v760_v18 = vmul.f32 0.5, %v744_v14  ;;  %v783_v30 = vmul.f32 %v767_v25, %v759_v17  ;;  %v799_v24 = vmul.f32 1.8666667, %v2068_v61  ;;  %v800_v37 = vmul.f32 1.8666667, %v2072_v5 }
 0x18e   : > { %v1916_v27 = vpack.i.bf16 %v762_v20, %v761_v19  ;;  %v823_v40 = vmul.f32 0.8, %v759_v17  ;;  %v786_v1 = vmul.f32 %v770_v6, %v762_v20  ;;  %v2401_v29 = vadd.f32 -0.75, %v785_v7 }
 0x18f   : > { %v1906_v23 = vpack.i.bf16 %v760_v18, %v759_v17  ;;  %v784_v31 = vmul.f32 %v768_v26, %v760_v18  ;;  %v2397_v35 = vadd.f32 -0.75, %v783_v30  ;;  %v824_v45 = vmul.f32 0.8, %v760_v18 }
 0x190   : > { %v802_v39 = vmul.f32 1.8666667, %v2070_v8  ;;  %v2406_v2 = vadd.f32 -0.75, %v786_v1  ;;  %v817_v46 = vmul.f32 %v2401_v29, %v801_v33  ;;  %v825_v51 = vmul.f32 0.8, %v761_v19 }
 0x191   : > { %1907 = vrot.lane.b32.xlu1 %v1906_v23, %s2172_s13  ;;  %v2399_v36 = vadd.f32 -0.75, %v784_v31  ;;  %v815_v43 = vmul.f32 %v2397_v35, %v799_v24  ;;  %v826_v58 = vmul.f32 0.8, %v762_v20 }
 0x192   : > { %v818_v57 = vmul.f32 %v2406_v2, %v802_v39  ;;  %v833_v61 = vsub.f32 %v817_v46, %v825_v51  ;;  %v688_v39 = vsub.f32 0.0, %v2362_v54  ;;  %v690_v46 = vsub.f32 0.0, %v2359_v52 }
 0x193   : > { %v2074_v32 = vpop.eup %2073  ;;  %v816_v0 = vmul.f32 %v2399_v36, %v800_v37  ;;  %v831_v3 = vsub.f32 %v815_v43, %v823_v40  ;;  %v691_v51 = vsub.f32 0.0, %v2374_v62 }
 0x194   : > { %v2076_v34 = vpop.eup %2075  ;;  %v749_v47 = vmul.f32 4.0, %v2074_v32  ;;  %v834_v10 = vsub.f32 %v818_v57, %v826_v58  ;;  %v773_v18 = vmul.f32 1.875, %v2074_v32  ;;  %v805_v6 = vmul.f32 1.8666667, %v2074_v32 }
 0x195   : > { %v2078_v38 = vpop.eup %2077  ;;  %v747_v41 = vmul.f32 4.0, %v2076_v34  ;;  %1917 = vrot.lane.b32.xlu1 %v1916_v27, %s2172_s13  ;;  %v832_v49 = vsub.f32 %v816_v0, %v824_v45  ;;  %v771_v11 = vmul.f32 1.875, %v2076_v34  ;;  %v803_v17 = vmul.f32 1.8666667, %v2076_v34 }
 0x196   : > { %v2080_v42 = vpop.eup %2079  ;;  %v750_v53 = vmul.f32 4.0, %v2078_v38  ;;  %v765_v8 = vmul.f32 0.5, %v749_v47  ;;  %v1911_v13 = vpack.i.bf16 %v834_v10, %v833_v61  ;;  %v774_v22 = vmul.f32 1.875, %v2078_v38 }
 0x197   : > { %v748_v44 = vmul.f32 4.0, %v2080_v42  ;;  %v763_v55 = vmul.f32 0.5, %v747_v41  ;;  %v1901_v60 = vpack.i.bf16 %v832_v49, %v831_v3  ;;  %v772_v5 = vmul.f32 1.875, %v2080_v42 }
 0x198   : > { %v766_v4 = vmul.f32 0.5, %v750_v53  ;;  %v804_v21 = vmul.f32 1.8666667, %v2080_v42  ;;  %v789_v25 = vmul.f32 %v773_v18, %v765_v8  ;;  %v806_v24 = vmul.f32 1.8666667, %v2078_v38 }
 0x199   : > { %v764_v56 = vmul.f32 0.5, %v748_v44  ;;  %1902 = vrot.lane.b32.xlu0 %v1901_v60, %s2172_s13  ;;  %v787_v15 = vmul.f32 %v771_v11, %v763_v55  ;;  %v827_v23 = vmul.f32 0.8, %v763_v55  ;;  %v829_v1 = vmul.f32 0.8, %v765_v8 }
 0x19a   : > { %v1936_v14 = vpack.i.bf16 %v766_v4, %v765_v8  ;;  %v790_v30 = vmul.f32 %v774_v22, %v766_v4  ;;  %v2420_v31 = vadd.f32 -0.75, %v789_v25  ;;  %v830_v42 = vmul.f32 0.8, %v766_v4 }
 0x19b   : > { %v1926_v63 = vpack.i.bf16 %v764_v56, %v763_v55  ;;  %v788_v16 = vmul.f32 %v772_v5, %v764_v56  ;;  %v2413_v19 = vadd.f32 -0.75, %v787_v15  ;;  %v828_v28 = vmul.f32 0.8, %v764_v56 }
 0x19c   : > { %v2422_v34 = vadd.f32 -0.75, %v790_v30  ;;  %v821_v37 = vmul.f32 %v2420_v31, %v805_v6  ;;  %v687_v32 = vsub.f32 0.0, %v2356_v50  ;;  %v689_v38 = vsub.f32 0.0, %v2354_v48 }
 0x19d   : > { %1927 = vrot.lane.b32.xlu1 %v1926_v63, %s2172_s13  ;;  %1912 = vrot.lane.b32.xlu0 %v1911_v13, %s2172_s13  ;;  %v2415_v20 = vadd.f32 -0.75, %v788_v16  ;;  %v819_v26 = vmul.f32 %v2413_v19, %v803_v17  ;;  %v697_v47 = vmul.f32 1.442695, %v688_v39  ;;  %v701_v49 = vmul.f32 1.442695, %v690_v46 }
 0x19e   : > { %v822_v41 = vmul.f32 %v2422_v34, %v806_v24  ;;  %v837_v43 = vsub.f32 %v821_v37, %v829_v1  ;;  %v695_v44 = vmul.f32 1.442695, %v687_v32  ;;  %v699_v3 = vmul.f32 1.442695, %v689_v38 }
 0x19f   : > { %v820_v27 = vmul.f32 %v2415_v20, %v804_v21  ;;  %v835_v7 = vsub.f32 %v819_v26, %v827_v23  ;;  %v692_v53 = vsub.f32 0.0, %v2386_v12  ;;  %v693_v55 = vsub.f32 0.0, %v2372_v59 }
 0x1a0   : > { %v838_v0 = vsub.f32 %v822_v41, %v830_v42  ;;  %2081 = vpow2.f32 %v695_v44  ;;  %v703_v56 = vmul.f32 1.442695, %v691_v51  ;;  %v694_v57 = vsub.f32 0.0, %v2377_v9 }
 0x1a1   : > { %1937 = vrot.lane.b32.xlu1 %v1936_v14, %s2172_s13  ;;  %v836_v33 = vsub.f32 %v820_v27, %v828_v28  ;;  %2083 = vpow2.f32 %v697_v47  ;;  %v705_v58 = vmul.f32 1.442695, %v692_v53  ;;  %v707_v63 = vmul.f32 1.442695, %v693_v55 }
 0x1a2   : > { %v1931_v45 = vpack.i.bf16 %v838_v0, %v837_v43  ;;  %2085 = vpow2.f32 %v699_v3  ;;  %v709_v10 = vmul.f32 1.442695, %v694_v57 }
 0x1a3   : > { %v1921_v40 = vpack.i.bf16 %v836_v33, %v835_v7  ;;  %2087 = vpow2.f32 %v701_v49 }
 0x1a4   : > { %2089 = vpow2.f32 %v703_v56 }
 0x1a5   : > { %1922 = vrot.lane.b32.xlu0 %v1921_v40, %s2172_s13  ;;  %2091 = vpow2.f32 %v705_v58 }
 0x1a6   : > { %2093 = vpow2.f32 %v707_v63 }
 0x1a7   : > { %2095 = vpow2.f32 %v709_v10 }
 0x1a9   : > { %1932 = vrot.lane.b32.xlu0 %v1931_v45, %s2172_s13 }
 0x1aa   : > { %v2082_v60 = vpop.eup %2081 }
 0x1ab   : > { %v2084_v61 = vpop.eup %2083  ;;  %v711_v8 = vadd.f32 1.0, %v2082_v60 }
 0x1ac   : > { %v2086_v4 = vpop.eup %2085  ;;  %v712_v11 = vadd.f32 1.0, %v2084_v61 }
 0x1ad   : > { %v2088_v5 = vpop.eup %2087  ;;  %v713_v13 = vadd.f32 1.0, %v2086_v4  ;;  %2097 = vrcp.f32 %v711_v8 }
 0x1ae   : > { %v714_v14 = vadd.f32 1.0, %v2088_v5  ;;  %2099 = vrcp.f32 %v712_v11  ;;  %v2090_v15 = vpop.eup %2089 }
 0x1af   : > { %2101 = vrcp.f32 %v713_v13  ;;  %v2092_v16 = vpop.eup %2091  ;;  %v715_v17 = vadd.f32 1.0, %v2090_v15 }
 0x1b0   : > { %2103 = vrcp.f32 %v714_v14  ;;  %v2094_v18 = vpop.eup %2093  ;;  %v716_v21 = vadd.f32 1.0, %v2092_v16 }
 0x1b1   : > { %v2096_v22 = vpop.eup %2095  ;;  %v717_v26 = vadd.f32 1.0, %v2094_v18  ;;  %2105 = vrcp.f32 %v715_v17 }
 0x1b2   : > { %v718_v27 = vadd.f32 1.0, %v2096_v22  ;;  %2107 = vrcp.f32 %v716_v21 }
 0x1b3   : > { %2109 = vrcp.f32 %v717_v26 }
 0x1b4   : > { %2111 = vrcp.f32 %v718_v27 }
 0x1b7   : > { %v2098_v23 = vpop.eup %2097 }
 0x1b8   : > { %v2100_v25 = vpop.eup %2099  ;;  %v727_v6 = vmul.f32 %v2098_v23, %v2356_v50 }
 0x1b9   : > { %v2102_v30 = vpop.eup %2101  ;;  %v728_v7 = vmul.f32 %v2100_v25, %v2362_v54 }
 0x1ba   : > { %v2104_v37 = vpop.eup %2103  ;;  %v729_v43 = vmul.f32 %v2102_v30, %v2354_v48 }
 0x1bb   : > { %v730_v0 = vmul.f32 %v2104_v37, %v2359_v52  ;;  %v2106_v39 = vpop.eup %2105  ;;  %v2009_v37 = vld [vmem:[%s2659_s5 + $0x60] sm:$0xff]  }
 0x1bc   : > { %v2108_v44 = vpop.eup %2107  ;;  %v731_v53 = vmul.f32 %v2106_v39, %v2374_v62 }
 0x1bd   : > { %v2110_v51 = vpop.eup %2109  ;;  %v732_v48 = vmul.f32 %v2108_v44, %v2386_v12 }
 0x1be   : > { %v2112_v56 = vpop.eup %2111  ;;  %v733_v12 = vmul.f32 %v2110_v51, %v2372_v59 }
 0x1bf   : > { %v734_v5 = vmul.f32 %v2112_v56, %v2377_v9 }
 0x203   : > { %v1908_v28 = vpop.permute.xlu1 %1907 }
 0x204   : > { %v1910_v33 = vunpack.i.h.bf16 %v1908_v28  ;;  %v1909_v24 = vunpack.i.l.bf16 %v1908_v28 }
 0x206   : > { %v903_v40 = vsel %vm609_vm3, %v727_v6, %v1909_v24  ;;  %v904_v41 = vsel %vm609_vm3, %v728_v7, %v1910_v33  ;;  %v2003_v6 = vld [vmem:[%s2659_s5 + $0x48] sm:$0xff]   ;;  %v2006_v7 = vld [vmem:[%s2659_s5 + $0x10] sm:$0xff]   ;;  %v2007_v33 = vld [vmem:[%s2659_s5 + $0x58] sm:$0xff]  }
 0x207   : > { %v1918_v1 = vpop.permute.xlu1 %1917  ;;  %v919_v42 = vpack.c.bf16 %v904_v41, %v903_v40  ;;  %v2008_v24 = vld [vmem:[%s2659_s5 + $0x18] sm:$0xff]   ;;  %v2010_v40 = vld [vmem:[%s2659_s5 + $0x20] sm:$0xff]  }
 0x208   : > { %v1920_v45 = vunpack.i.h.bf16 %v1918_v1  ;;  %v1919_v32 = vunpack.i.l.bf16 %v1918_v1  ;;  %v2501_v1 = vld [vmem:[%s2658_s4] ss:$0 sm:$0xff] }
 0x20a   : > { %v905_v50 = vsel %vm609_vm3, %v729_v43, %v1919_v32  ;;  %v906_v54 = vsel %vm609_vm3, %v730_v0, %v1920_v45 }
 0x20b   : > { %v921_v38 = vpack.c.bf16 %v906_v54, %v905_v50  ;;  %v1903_v46 = vpop.permute.xlu0 %1902 }
 0x20c   : > { %v1905_v47 = vunpack.i.h.bf16 %v1903_v46  ;;  %v1904_v3 = vunpack.i.l.bf16 %v1903_v46 }
 0x20e   : > { %v911_v57 = vsel %vm609_vm3, %v2397_v35, %v1904_v3  ;;  %v912_v58 = vsel %vm609_vm3, %v2399_v36, %v1905_v47 }
 0x20f   : > { %v1928_v49 = vpop.permute.xlu1 %1927  ;;  %v1913_v60 = vpop.permute.xlu0 %1912  ;;  %v920_v61 = vpack.c.bf16 %v912_v58, %v911_v57 }
 0x210   : > { %v1930_v55 = vunpack.i.h.bf16 %v1928_v49  ;;  %v1929_v52 = vunpack.i.l.bf16 %v1928_v49  ;;  %v1915_v8 = vunpack.i.h.bf16 %v1913_v60  ;;  %v1914_v4 = vunpack.i.l.bf16 %v1913_v60 }
 0x211   : > { %1094 = vmatprep.mubr.bf16.mxu1 %v920_v61 }
 0x212   : > { %v907_v63 = vsel %vm609_vm3, %v731_v53, %v1929_v52  ;;  %v908_v10 = vsel %vm609_vm3, %v732_v48, %v1930_v55  ;;  %1095 = vmatmul.mubr.bf16.vlgmr.msra.gmra.mrb[0].mxu1 %v919_v42  ;;  %v913_v36 = vsel %vm609_vm3, %v2401_v29, %v1914_v4  ;;  %v914_v14 = vsel %vm609_vm3, %v2406_v2, %v1915_v8  ;;  %v2011_v53 = vld [vmem:[%s2659_s5 + $0x68] sm:$0xff]   ;;  %v2013_v55 = vld [vmem:[%s2659_s5 + $0x70] sm:$0xff]  }
 0x213   : > { %v1938_v62 = vpop.permute.xlu1 %1937  ;;  %v923_v11 = vpack.c.bf16 %v908_v10, %v907_v63  ;;  %v922_v15 = vpack.c.bf16 %v914_v14, %v913_v36  ;;  %v2012_v48 = vld [vmem:[%s2659_s5 + $0x28] sm:$0xff]   ;;  %v2014_v10 = vld [vmem:[%s2659_s5 + $0x30] sm:$0xff]  }
 0x214   : > { %v1940_v13 = vunpack.i.h.bf16 %v1938_v62  ;;  %v1939_v35 = vunpack.i.l.bf16 %v1938_v62 }
 0x215   : > { %1102 = vmatprep.mubr.bf16.mxu1 %v922_v15 }
 0x216   : > { %v909_v16 = vsel %vm609_vm3, %v733_v12, %v1939_v35  ;;  %v910_v17 = vsel %vm609_vm3, %v734_v5, %v1940_v13  ;;  %v2015_v13 = vld [vmem:[%s2659_s5 + $0x78] sm:$0xff]  }
 0x217   : > { %v925_v18 = vpack.c.bf16 %v910_v17, %v909_v16  ;;  %v1923_v59 = vpop.permute.xlu0 %1922  ;;  %v2016_v16 = vld [vmem:[%s2659_s5 + $0x38] sm:$0xff]  }
 0x218   : > { %v1925_v21 = vunpack.i.h.bf16 %v1923_v59  ;;  %v1924_v9 = vunpack.i.l.bf16 %v1923_v59 }
 0x21a   : > { %1103 = vmatmul.mubr.bf16.gmra.mrb[4].mxu1 %v921_v38  ;;  %v915_v22 = vsel %vm609_vm3, %v2413_v19, %v1924_v9  ;;  %v916_v29 = vsel %vm609_vm3, %v2415_v20, %v1925_v21  ;;  %v2001_v19 = vld [vmem:[%s2659_s5 + $0x40] sm:$0xff]  }
 0x21b   : > { %v1933_v23 = vpop.permute.xlu0 %1932  ;;  %v924_v25 = vpack.c.bf16 %v916_v29, %v915_v22  ;;  %v2002_v20 = vld [vmem:[%s2659_s5] sm:$0xff]   ;;  %1757 = vmatprep.subr.bf16.mxu0 %v2001_v19  ;;  %1813 = vmatprep.subr.bf16.mxu1 %v2001_v19 }
 0x21c   : > { %v1935_v2 = vunpack.i.h.bf16 %v1933_v23  ;;  %v1934_v26 = vunpack.i.l.bf16 %v1933_v23  ;;  %1758 = vmatpush3.bf16.msra.mxu0 %v2002_v20  ;;  %1821 = vmatpush3.bf16.msra.mxu1 %v2002_v20 }
 0x21d   : > { %1110 = vmatprep.mubr.bf16.mxu1 %v924_v25  ;;  %1759 = vmatprep.subr.bf16.mxu0 %v2003_v6 }
 0x21e   : > { %v917_v27 = vsel %vm609_vm3, %v2420_v31, %v1934_v26  ;;  %v918_v28 = vsel %vm609_vm3, %v2422_v34, %v1935_v2  ;;  %v2004_v31 = vld [vmem:[%s2659_s5 + $0x8] sm:$0xff]   ;;  %v2005_v34 = vld [vmem:[%s2659_s5 + $0x50] sm:$0xff]   ;;  %1814 = vmatprep.subr.bf16.mxu1 %v2003_v6 }
 0x21f   : > { %v926_v30 = vpack.c.bf16 %v918_v28, %v917_v27 }
 0x220   : > { %1760 = vmatpush3.bf16.msra.mxu0 %v2004_v31  ;;  %1822 = vmatpush3.bf16.msra.mxu1 %v2004_v31 }
 0x221   : > { %1761 = vmatprep.subr.bf16.mxu0 %v2005_v34  ;;  %1815 = vmatprep.subr.bf16.mxu1 %v2005_v34 }
 0x222   : > { %1111 = vmatmul.mubr.bf16.gmra.mrb[8].mxu1 %v923_v11 }
 0x223   : > { %1118 = vmatprep.mubr.bf16.mxu1 %v926_v30 }
 0x224   : > { %1762 = vmatpush3.bf16.msra.mxu0 %v2006_v7  ;;  %1823 = vmatpush3.bf16.msra.mxu1 %v2006_v7 }
 0x225   : > { %1763 = vmatprep.subr.bf16.mxu0 %v2007_v33  ;;  %1816 = vmatprep.subr.bf16.mxu1 %v2007_v33 }
 0x228   : > { %1764 = vmatpush3.bf16.msra.mxu0 %v2008_v24  ;;  %1824 = vmatpush3.bf16.msra.mxu1 %v2008_v24 }
 0x229   : > { %1765 = vmatprep.subr.bf16.mxu0 %v2009_v37  ;;  %1817 = vmatprep.subr.bf16.mxu1 %v2009_v37 }
 0x22a   : > { %1119 = vmatmul.mubr.bf16.gmra.mrb[12].mxu1 %v925_v18 }
 0x22c   : > { %1766 = vmatpush3.bf16.msra.mxu0 %v2010_v40  ;;  %1825 = vmatpush3.bf16.msra.mxu1 %v2010_v40 }
 0x22d   : > { %1767 = vmatprep.subr.bf16.mxu0 %v2011_v53  ;;  %1818 = vmatprep.subr.bf16.mxu1 %v2011_v53 }
 0x230   : > { %1768 = vmatpush3.bf16.msra.mxu0 %v2012_v48  ;;  %1826 = vmatpush3.bf16.msra.mxu1 %v2012_v48 }
 0x231   : > { %1769 = vmatprep.subr.bf16.mxu0 %v2013_v55  ;;  %1819 = vmatprep.subr.bf16.mxu1 %v2013_v55 }
 0x234   : > { %1770 = vmatpush3.bf16.msra.mxu0 %v2014_v10  ;;  %1827 = vmatpush3.bf16.msra.mxu1 %v2014_v10 }
 0x235   : > { %1771 = vmatprep.subr.bf16.mxu0 %v2015_v13  ;;  %1820 = vmatprep.subr.bf16.mxu1 %v2015_v13 }
 0x238   : > { %1772 = vmatpush3.bf16.msra.mxu0 %v2016_v16  ;;  %1828 = vmatpush3.bf16.msra.mxu1 %v2016_v16 }
 0x2e5   : > { %v1733_v41 = vpop.f32.mrb[0].mxu1 }
 0x2e6   : > { %v1734_v42 = vpop.f32.mrb[1].mxu1 }
 0x2e7   : > { %v1735_v43 = vadd.f32 %v1734_v42, %v1733_v41  ;;  %v1736_v0 = vpop.f32.mrb[2].mxu1 }
 0x2e8   : > { %v1737_v45 = vpop.f32.mrb[3].mxu1 }
 0x2e9   : > { %v2504_v32 = vadd.f32 %v1735_v43, %v2501_v1  ;;  %v1738_v50 = vadd.f32 %v1737_v45, %v1736_v0 }
 0x2eb   : > { %2113 = vtanh.f32 %v2504_v32  ;;  %v2508_v54 = vadd.f32 %v1738_v50, %v2501_v1 }
 0x2ed   : > { %2115 = vtanh.f32 %v2508_v54  ;;  %v1739_v39 = vpop.f32.mrb[4].mxu1 }
 0x2ee   : > { %v1740_v38 = vpop.f32.mrb[5].mxu1 }
 0x2ef   : > { %v1741_v44 = vadd.f32 %v1740_v38, %v1739_v39  ;;  %v1742_v46 = vpop.f32.mrb[6].mxu1 }
 0x2f0   : > { %v1743_v47 = vpop.f32.mrb[7].mxu1 }
 0x2f1   : > { %v2512_v3 = vadd.f32 %v1741_v44, %v2501_v1  ;;  %v1744_v49 = vadd.f32 %v1743_v47, %v1742_v46 }
 0x2f3   : > { %2117 = vtanh.f32 %v2512_v3  ;;  %v2516_v51 = vadd.f32 %v1744_v49, %v2501_v1 }
 0x2f5   : > { %v2114_v52 = vpop.eup %2113  ;;  %2119 = vtanh.f32 %v2516_v51  ;;  %v1745_v56 = vpop.f32.mrb[8].mxu1 }
 0x2f6   : > { %v1746_v57 = vpop.f32.mrb[9].mxu1  ;;  %v1183_v58 = vmul.f32 4.0, %v2114_v52  ;;  %v1207_v11 = vmul.f32 1.875, %v2114_v52  ;;  %v1239_v22 = vmul.f32 1.8666667, %v2114_v52 }
 0x2f7   : > { %v2116_v60 = vpop.eup %2115  ;;  %v1747_v61 = vadd.f32 %v1746_v57, %v1745_v56  ;;  %v1748_v63 = vpop.f32.mrb[10].mxu1 }
 0x2f8   : > { %v1749_v8 = vpop.f32.mrb[11].mxu1  ;;  %v1184_v4 = vmul.f32 4.0, %v2116_v60  ;;  %v1199_v62 = vmul.f32 0.5, %v1183_v58  ;;  %v1208_v36 = vmul.f32 1.875, %v2116_v60  ;;  %v1240_v2 = vmul.f32 1.8666667, %v2116_v60 }
 0x2f9   : > { %v2532_v12 = vadd.f32 %v1747_v61, %v2501_v1  ;;  %v1750_v5 = vadd.f32 %v1749_v8, %v1748_v63 }
 0x2fa   : > { %v1200_v35 = vmul.f32 0.5, %v1184_v4  ;;  %v1223_v14 = vmul.f32 %v1207_v11, %v1199_v62  ;;  %v1263_v19 = vmul.f32 0.8, %v1199_v62 }
 0x2fb   : > { %2121 = vtanh.f32 %v2532_v12  ;;  %v2539_v15 = vadd.f32 %v1750_v5, %v2501_v1 }
 0x2fc   : > { %v1946_v17 = vpack.i.bf16 %v1200_v35, %v1199_v62  ;;  %v1224_v18 = vmul.f32 %v1208_v36, %v1200_v35  ;;  %v2545_v9 = vadd.f32 -0.75, %v1223_v14  ;;  %v1264_v7 = vmul.f32 0.8, %v1200_v35 }
 0x2fd   : > { %v2118_v59 = vpop.eup %2117  ;;  %2123 = vtanh.f32 %v2539_v15  ;;  %v1751_v21 = vpop.f32.mrb[12].mxu1 }
 0x2fe   : > { %v1752_v29 = vpop.f32.mrb[13].mxu1  ;;  %1947 = vrot.lane.b32.xlu1 %v1946_v17, %s2172_s13  ;;  %v1185_v23 = vmul.f32 4.0, %v2118_v59  ;;  %v2548_v25 = vadd.f32 -0.75, %v1224_v18  ;;  %v1255_v30 = vmul.f32 %v2545_v9, %v1239_v22  ;;  %v1209_v37 = vmul.f32 1.875, %v2118_v59 }
 0x2ff   : > { %v2120_v26 = vpop.eup %2119  ;;  %v1753_v27 = vadd.f32 %v1752_v29, %v1751_v21  ;;  %v1754_v28 = vpop.f32.mrb[14].mxu1  ;;  %v1241_v47 = vmul.f32 1.8666667, %v2118_v59 }
 0x300   : > { %v1755_v20 = vpop.f32.mrb[15].mxu1  ;;  %v1186_v6 = vmul.f32 4.0, %v2120_v26  ;;  %v1201_v31 = vmul.f32 0.5, %v1185_v23  ;;  %v1256_v34 = vmul.f32 %v2548_v25, %v1240_v2  ;;  %v1271_v41 = vsub.f32 %v1255_v30, %v1263_v19 }
 0x301   : > { %v2553_v33 = vadd.f32 %v1753_v27, %v2501_v1  ;;  %v1756_v24 = vadd.f32 %v1755_v20, %v1754_v28  ;;  %v1210_v0 = vmul.f32 1.875, %v2120_v26 }
 0x302   : > { %v1202_v40 = vmul.f32 0.5, %v1186_v6  ;;  %v1272_v42 = vsub.f32 %v1256_v34, %v1264_v7  ;;  %v1225_v45 = vmul.f32 %v1209_v37, %v1201_v31  ;;  %v1265_v56 = vmul.f32 0.8, %v1201_v31 }
 0x303   : > { %2125 = vtanh.f32 %v2553_v33  ;;  %v2557_v43 = vadd.f32 %v1756_v24, %v2501_v1  ;;  %v1242_v1 = vmul.f32 1.8666667, %v2120_v26 }
 0x304   : > { %v1956_v50 = vpack.i.bf16 %v1202_v40, %v1201_v31  ;;  %v1941_v39 = vpack.i.bf16 %v1272_v42, %v1271_v41  ;;  %v1226_v44 = vmul.f32 %v1210_v0, %v1202_v40  ;;  %v2562_v46 = vadd.f32 -0.75, %v1225_v45 }
 0x305   : > { %v2122_v38 = vpop.eup %2121  ;;  %2127 = vtanh.f32 %v2557_v43  ;;  %v1266_v57 = vmul.f32 0.8, %v1202_v40 }
 0x306   : > { %1957 = vrot.lane.b32.xlu1 %v1956_v50, %s2172_s13  ;;  %1942 = vrot.lane.b32.xlu0 %v1941_v39, %s2172_s13  ;;  %v2564_v53 = vadd.f32 -0.75, %v1226_v44  ;;  %v1257_v48 = vmul.f32 %v2562_v46, %v1241_v47  ;;  %v1187_v55 = vmul.f32 4.0, %v2122_v38  ;;  %v1211_v61 = vmul.f32 1.875, %v2122_v38 }
 0x307   : > { %v2124_v49 = vpop.eup %2123  ;;  %v1243_v36 = vmul.f32 1.8666667, %v2122_v38  ;;  %v1127_v47 = vsub.f32 0.0, %v2504_v32 }
 0x308   : > { %v1258_v52 = vmul.f32 %v2564_v53, %v1242_v1  ;;  %v1188_v58 = vmul.f32 4.0, %v2124_v49  ;;  %v1203_v60 = vmul.f32 0.5, %v1187_v55  ;;  %v1273_v63 = vsub.f32 %v1257_v48, %v1265_v56 }
 0x309   : > { %v1212_v4 = vmul.f32 1.875, %v2124_v49  ;;  %v1244_v59 = vmul.f32 1.8666667, %v2124_v49  ;;  %v1128_v49 = vsub.f32 0.0, %v2508_v54  ;;  %v1135_v1 = vmul.f32 1.442695, %v1127_v47 }
 0x30a   : > { %v1274_v10 = vsub.f32 %v1258_v52, %v1266_v57  ;;  %v1204_v8 = vmul.f32 0.5, %v1188_v58  ;;  %v1227_v62 = vmul.f32 %v1211_v61, %v1203_v60  ;;  %v1267_v26 = vmul.f32 0.8, %v1203_v60 }
 0x30b   : > { %v1137_v48 = vmul.f32 1.442695, %v1128_v49  ;;  %v1129_v55 = vsub.f32 0.0, %v2512_v3  ;;  %2129 = vpow2.f32 %v1135_v1  ;;  %v1130_v52 = vsub.f32 0.0, %v2516_v51 }
 0x30c   : > { %v1951_v5 = vpack.i.bf16 %v1274_v10, %v1273_v63  ;;  %v1228_v13 = vmul.f32 %v1212_v4, %v1204_v8  ;;  %v2568_v35 = vadd.f32 -0.75, %v1227_v62  ;;  %v1971_v14 = vpack.i.bf16 %v1204_v8, %v1203_v60 }
 0x30d   : > { %v2126_v11 = vpop.eup %2125  ;;  %v1268_v27 = vmul.f32 0.8, %v1204_v8  ;;  %2131 = vpow2.f32 %v1137_v48  ;;  %v1139_v56 = vmul.f32 1.442695, %v1129_v55  ;;  %v1141_v57 = vmul.f32 1.442695, %v1130_v52 }
 0x30e   : > { %v1189_v16 = vmul.f32 4.0, %v2126_v11  ;;  %1952 = vrot.lane.b32.xlu0 %v1951_v5, %s2172_s13  ;;  %v2571_v18 = vadd.f32 -0.75, %v1228_v13  ;;  %v1259_v21 = vmul.f32 %v2568_v35, %v1243_v36  ;;  %v1213_v23 = vmul.f32 1.875, %v2126_v11 }
 0x30f   : > { %v2128_v17 = vpop.eup %2127  ;;  %v1245_v7 = vmul.f32 1.8666667, %v2126_v11  ;;  %2133 = vpow2.f32 %v1139_v56  ;;  %v1131_v11 = vsub.f32 0.0, %v2532_v12  ;;  %v1132_v5 = vsub.f32 0.0, %v2539_v15 }
 0x310   : > { %v1190_v22 = vmul.f32 4.0, %v2128_v17  ;;  %v1205_v29 = vmul.f32 0.5, %v1189_v16  ;;  %v1260_v2 = vmul.f32 %v2571_v18, %v1244_v59  ;;  %v1214_v30 = vmul.f32 1.875, %v2128_v17 }
 0x311   : > { %v1275_v20 = vsub.f32 %v1259_v21, %v1267_v26  ;;  %v1246_v41 = vmul.f32 1.8666667, %v2128_v17  ;;  %2135 = vpow2.f32 %v1141_v57  ;;  %v1143_v13 = vmul.f32 1.442695, %v1131_v11 }
 0x312   : > { %v1206_v28 = vmul.f32 0.5, %v1190_v22  ;;  %v1229_v19 = vmul.f32 %v1213_v23, %v1205_v29  ;;  %v1276_v6 = vsub.f32 %v1260_v2, %v1268_v27  ;;  %v1269_v45 = vmul.f32 0.8, %v1205_v29 }
 0x313   : > { %v1145_v36 = vmul.f32 1.442695, %v1132_v5  ;;  %v1133_v17 = vsub.f32 0.0, %v2553_v33  ;;  %v1134_v59 = vsub.f32 0.0, %v2557_v43 }
 0x314   : > { %v1230_v31 = vmul.f32 %v1214_v30, %v1206_v28  ;;  %v2575_v34 = vadd.f32 -0.75, %v1229_v19  ;;  %v1961_v24 = vpack.i.bf16 %v1276_v6, %v1275_v20  ;;  %v1976_v37 = vpack.i.bf16 %v1206_v28, %v1205_v29 }
 0x315   : > { %v1270_v50 = vmul.f32 0.8, %v1206_v28  ;;  %v2130_v58 = vpop.eup %2129  ;;  %v1147_v26 = vmul.f32 1.442695, %v1133_v17  ;;  %v1149_v27 = vmul.f32 1.442695, %v1134_v59 }
 0x316   : > { %v2577_v40 = vadd.f32 -0.75, %v1230_v31  ;;  %v1261_v42 = vmul.f32 %v2575_v34, %v1245_v7  ;;  %1962 = vrot.lane.b32.xlu0 %v1961_v24, %s2172_s13  ;;  %v1151_v61 = vadd.f32 1.0, %v2130_v58 }
 0x317   : > { %v2132_v60 = vpop.eup %2131 }
 0x318   : > { %v1262_v0 = vmul.f32 %v2577_v40, %v1246_v41  ;;  %v1277_v39 = vsub.f32 %v1261_v42, %v1269_v45  ;;  %v1152_v63 = vadd.f32 1.0, %v2132_v60  ;;  %2137 = vrcp.f32 %v1151_v61 }
 0x319   : > { %v2134_v10 = vpop.eup %2133 }
 0x31a   : > { %v1278_v38 = vsub.f32 %v1262_v0, %v1270_v50  ;;  %1972 = vrot.lane.b32.xlu0 %v1971_v14, %s2172_s13  ;;  %2139 = vrcp.f32 %v1152_v63  ;;  %v1153_v4 = vadd.f32 1.0, %v2134_v10 }
 0x31b   : > { %v2136_v8 = vpop.eup %2135 }
 0x31c   : > { %v1966_v44 = vpack.i.bf16 %v1278_v38, %v1277_v39  ;;  %v1154_v62 = vadd.f32 1.0, %v2136_v8  ;;  %2141 = vrcp.f32 %v1153_v4 }
 0x31e   : > { %1967 = vrot.lane.b32.xlu1 %v1966_v44, %s2172_s13  ;;  %2143 = vrcp.f32 %v1154_v62 }
 0x31f   : > { %2145 = vpow2.f32 %v1143_v13 }
 0x320   : > { %2147 = vpow2.f32 %v1145_v36 }
 0x321   : > { %2149 = vpow2.f32 %v1147_v26 }
 0x322   : > { %1977 = vrot.lane.b32.xlu1 %v1976_v37, %s2172_s13  ;;  %v2138_v14 = vpop.eup %2137  ;;  %2151 = vpow2.f32 %v1149_v27 }
 0x323   : > { %v1167_v22 = vmul.f32 %v2138_v14, %v2504_v32 }
 0x324   : > { %v2140_v16 = vpop.eup %2139 }
 0x325   : > { %v1168_v29 = vmul.f32 %v2140_v16, %v2508_v54 }
 0x326   : > { %v2142_v19 = vpop.eup %2141 }
 0x327   : > { %v1169_v31 = vmul.f32 %v2142_v19, %v2512_v3 }
 0x328   : > { %v2144_v6 = vpop.eup %2143 }
 0x329   : > { %v1170_v7 = vmul.f32 %v2144_v6, %v2516_v51  ;;  %v2146_v54 = vpop.eup %2145 }
 0x32a   : > { %v2148_v45 = vpop.eup %2147  ;;  %v1155_v44 = vadd.f32 1.0, %v2146_v54 }
 0x32b   : > { %v1156_v49 = vadd.f32 1.0, %v2148_v45  ;;  %v2150_v1 = vpop.eup %2149 }
 0x32c   : > { %2153 = vrcp.f32 %v1155_v44  ;;  %v2152_v48 = vpop.eup %2151  ;;  %v1157_v56 = vadd.f32 1.0, %v2150_v1 }
 0x32d   : > { %2155 = vrcp.f32 %v1156_v49  ;;  %v1158_v57 = vadd.f32 1.0, %v2152_v48 }
 0x32e   : > { %2157 = vrcp.f32 %v1157_v56 }
 0x32f   : > { %2159 = vrcp.f32 %v1158_v57 }
 0x336   : > { %v2154_v63 = vpop.eup %2153 }
 0x337   : > { %v2156_v4 = vpop.eup %2155 }
 0x338   : > { %v1172_v13 = vmul.f32 %v2156_v4, %v2539_v15 }
 0x370   : > { %v1948_v21 = vpop.permute.xlu1 %1947 }
 0x371   : > { %v1950_v23 = vunpack.i.h.bf16 %v1948_v21  ;;  %v1949_v2 = vunpack.i.l.bf16 %v1948_v21  ;;  %v2158_v21 = vpop.eup %2157 }
 0x372   : > { %v1173_v26 = vmul.f32 %v2158_v21, %v2553_v33 }
 0x373   : > { %v1344_v28 = vsel %vm609_vm3, %v1168_v29, %v1950_v23  ;;  %v1343_v30 = vsel %vm609_vm3, %v1167_v22, %v1949_v2  ;;  %v2160_v23 = vpop.eup %2159 }
 0x374   : > { %v1359_v20 = vpack.c.bf16 %v1344_v28, %v1343_v30  ;;  %v1174_v27 = vmul.f32 %v2160_v23, %v2557_v43 }
 0x378   : > { %v1958_v32 = vpop.permute.xlu1 %1957  ;;  %v1943_v24 = vpop.permute.xlu0 %1942 }
 0x379   : > { %v1960_v37 = vunpack.i.h.bf16 %v1958_v32  ;;  %v1959_v41 = vunpack.i.l.bf16 %v1958_v32  ;;  %v1945_v42 = vunpack.i.h.bf16 %v1943_v24  ;;  %v1944_v0 = vunpack.i.l.bf16 %v1943_v24 }
 0x37b   : > { %v1351_v50 = vsel %vm609_vm3, %v2545_v9, %v1944_v0  ;;  %v1352_v39 = vsel %vm609_vm3, %v2548_v25, %v1945_v42  ;;  %v1345_v38 = vsel %vm609_vm3, %v1169_v31, %v1959_v41  ;;  %v1346_v3 = vsel %vm609_vm3, %v1170_v7, %v1960_v37 }
 0x37c   : > { %v1360_v51 = vpack.c.bf16 %v1352_v39, %v1351_v50  ;;  %v1361_v47 = vpack.c.bf16 %v1346_v3, %v1345_v38 }
 0x37e   : > { %1534 = vmatprep.mubr.bf16.mxu0 %v1360_v51 }
 0x37f   : > { %1535 = vmatmul.mubr.bf16.vlgmr.msra.gmra.mrb[8].mxu0 %v1359_v20 }
 0x380   : > { %v1953_v55 = vpop.permute.xlu0 %1952 }
 0x381   : > { %v1955_v52 = vunpack.i.h.bf16 %v1953_v55  ;;  %v1954_v9 = vunpack.i.l.bf16 %v1953_v55 }
 0x383   : > { %v1353_v25 = vsel %vm609_vm3, %v2562_v46, %v1954_v9  ;;  %v1354_v58 = vsel %vm609_vm3, %v2564_v53, %v1955_v52  ;;  %v1171_v53 = vmul.f32 %v2154_v63, %v2532_v12 }
 0x384   : > { %v1362_v60 = vpack.c.bf16 %v1354_v58, %v1353_v25 }
 0x386   : > { %1542 = vmatprep.mubr.bf16.mxu0 %v1362_v60 }
 0x387   : > { %1543 = vmatmul.mubr.bf16.gmra.mrb[12].mxu0 %v1361_v47 }
 0x388   : > { %v1963_v61 = vpop.permute.xlu0 %1962 }
 0x389   : > { %v1965_v10 = vunpack.i.h.bf16 %v1963_v61  ;;  %v1964_v8 = vunpack.i.l.bf16 %v1963_v61 }
 0x38b   : > { %v1355_v62 = vsel %vm609_vm3, %v2568_v35, %v1964_v8  ;;  %v1356_v11 = vsel %vm609_vm3, %v2571_v18, %v1965_v10 }
 0x38c   : > { %v1973_v46 = vpop.permute.xlu0 %1972  ;;  %v1364_v5 = vpack.c.bf16 %v1356_v11, %v1355_v62 }
 0x38d   : > { %v1975_v36 = vunpack.i.h.bf16 %v1973_v46  ;;  %v1974_v14 = vunpack.i.l.bf16 %v1973_v46 }
 0x38e   : > { %1550 = vmatprep.mubr.bf16.mxu0 %v1364_v5 }
 0x38f   : > { %v1347_v17 = vsel %vm609_vm3, %v1171_v53, %v1974_v14  ;;  %v1348_v59 = vsel %vm609_vm3, %v1172_v13, %v1975_v36 }
 0x390   : > { %v1968_v16 = vpop.permute.xlu1 %1967  ;;  %v1363_v29 = vpack.c.bf16 %v1348_v59, %v1347_v17 }
 0x391   : > { %v1970_v22 = vunpack.i.h.bf16 %v1968_v16  ;;  %v1969_v35 = vunpack.i.l.bf16 %v1968_v16 }
 0x392   : > { %1551 = vmatmul.mubr.bf16.gmra.mrb[16].mxu0 %v1363_v29 }
 0x393   : > { %v1357_v18 = vsel %vm609_vm3, %v2575_v34, %v1969_v35  ;;  %v1358_v12 = vsel %vm609_vm3, %v2577_v40, %v1970_v22  ;;  %v1690_v40 = vld [vmem:[%s2660_s6] ss:$0 sm:$0xff] }
 0x394   : > { %v1978_v15 = vpop.permute.xlu1 %1977  ;;  %v1366_v2 = vpack.c.bf16 %v1358_v12, %v1357_v18 }
 0x395   : > { %v1980_v28 = vunpack.i.h.bf16 %v1978_v15  ;;  %v1979_v30 = vunpack.i.l.bf16 %v1978_v15 }
 0x396   : > { %1558 = vmatprep.mubr.bf16.mxu1 %v1366_v2 }
 0x397   : > { %v1350_v19 = vsel %vm609_vm3, %v1174_v27, %v1980_v28  ;;  %v1349_v20 = vsel %vm609_vm3, %v1173_v26, %v1979_v30 }
 0x398   : > { %v1365_v6 = vpack.c.bf16 %v1350_v19, %v1349_v20 }
 0x39a   : > { %1559 = vmatmul.mubr.bf16.vlgmr.msra.gmra.mrb[16].mxu1 %v1365_v6 }
 0x452   : > { %v1773_v34 = vpop.f32.mrb[8].mxu0 }
 0x453   : > { %v1774_v31 = vpop.f32.mrb[9].mxu0 }
 0x454   : > { %v1775_v7 = vadd.f32 %v1774_v31, %v1773_v34  ;;  %v1776_v32 = vpop.f32.mrb[10].mxu0 }
 0x455   : > { %v1777_v33 = vpop.f32.mrb[11].mxu0 }
 0x456   : > { %v1537_v43 = vadd.f32 %v1775_v7, %v1690_v40  ;;  %v1778_v24 = vadd.f32 %v1777_v33, %v1776_v32 }
 0x458   : > { %1567 = vst.msk [vmem:[%s2633_s12] sm:$0xff] %vm548_vm1, %v1537_v43  ;;  %v1540_v54 = vadd.f32 %v1778_v24, %v1690_v40 }
 0x45a   : > { %1568 = vst.msk [vmem:[%s2633_s12 + $0x8] sm:$0xff] %vm548_vm1, %v1540_v54  ;;  %v1779_v37 = vpop.f32.mrb[12].mxu0 }
 0x45b   : > { %v1780_v41 = vpop.f32.mrb[13].mxu0 }
 0x45c   : > { %v1781_v42 = vadd.f32 %v1780_v41, %v1779_v37  ;;  %v1782_v0 = vpop.f32.mrb[14].mxu0 }
 0x45d   : > { %v1783_v45 = vpop.f32.mrb[15].mxu0 }
 0x45e   : > { %v1545_v50 = vadd.f32 %v1781_v42, %v1690_v40  ;;  %v1784_v39 = vadd.f32 %v1783_v45, %v1782_v0 }
 0x460   : > { %1569 = vst.msk [vmem:[%s2633_s12 + $0x10] sm:$0xff] %vm548_vm1, %v1545_v50  ;;  %v1548_v38 = vadd.f32 %v1784_v39, %v1690_v40 }
 0x462   : > { %1570 = vst.msk [vmem:[%s2633_s12 + $0x18] sm:$0xff] %vm548_vm1, %v1548_v38 }
 0x465   : > { %v1785_v3 = vpop.f32.mrb[16].mxu0 }
 0x466   : > { %v1786_v44 = vpop.f32.mrb[17].mxu0 }
 0x467   : > { %v1787_v51 = vadd.f32 %v1786_v44, %v1785_v3  ;;  %v1788_v47 = vpop.f32.mrb[18].mxu0 }
 0x468   : > { %v1789_v49 = vpop.f32.mrb[19].mxu0 }
 0x469   : > { %v1553_v1 = vadd.f32 %v1787_v51, %v1690_v40  ;;  %v1790_v48 = vadd.f32 %v1789_v49, %v1788_v47 }
 0x46b   : > { %1571 = vst.msk [vmem:[%s2633_s12 + $0x20] sm:$0xff] %vm548_vm1, %v1553_v1  ;;  %v1556_v55 = vadd.f32 %v1790_v48, %v1690_v40 }
 0x46d   : > { %v1791_v52 = vpop.f32.mrb[16].mxu1  ;;  %1572 = vst.msk [vmem:[%s2633_s12 + $0x28] sm:$0xff] %vm548_vm1, %v1556_v55 }
 0x46e   : > { %v1792_v9 = vpop.f32.mrb[17].mxu1 }
 0x46f   : > { %v1793_v56 = vadd.f32 %v1792_v9, %v1791_v52  ;;  %v1794_v57 = vpop.f32.mrb[18].mxu1 }
 0x470   : > { %v1795_v25 = vpop.f32.mrb[19].mxu1 }
 0x471   : > { %v1561_v58 = vadd.f32 %v1793_v56, %v1690_v40  ;;  %v1796_v60 = vadd.f32 %v1795_v25, %v1794_v57 }
 0x473   : > { %1573 = vst.msk [vmem:[%s2633_s12 + $0x30] sm:$0xff] %vm548_vm1, %v1561_v58  ;;  %v1564_v61 = vadd.f32 %v1796_v60, %v1690_v40 }
 0x475   : > { %1574 = vst.msk [vmem:[%s2633_s12 + $0x38] sm:$0xff] %vm548_vm1, %v1564_v61 }
 0x476 PF: > { %s17_s24 = sadd.s32 1, %s2167_s24  }
 0x477   : > { %p14_p4 = scmp.ge.s32.totalorder %s17_s24, 4  }
 0x479   :  { %16 = sbr.rel (!%p14_p4) target bundleno = 1 (0x1), region = 78 }

</bundles_post_ra>
